<compile_context>
chip_gen: v7x
topology: tpu7x:2x2x1
jax: 0.10.0
libtpu: 0.0.40
codegen_flags: <defaults>
</compile_context>

<pallas_src>
import jax
import jax.numpy as jnp
from jax import lax
from jax.experimental import pallas as pl
from jax.experimental.pallas import tpu as pltpu

# PyTorch conv window offsets (dy, dx) for the 8 direction filters.
_OFFSETS = ((-1, -1), (-1, 0), (-1, 1),
            (0, -1),           (0, 1),
            (1, -1),  (1, 0),  (1, 1))


def _roll(x, shift, axis):
    """pltpu.roll with the shift normalized to [0, n) (no negative shifts)."""
    n = x.shape[axis]
    shift = shift % n
    if shift == 0:
        return x
    return pltpu.roll(x, shift=shift, axis=axis)


def _accumulate(img, seg, img_above, img_below, seg_above, seg_below,
                neg_inv_sigma):
    """Per-pixel loss accumulator for one (C, TH, W) image / (TH, W) segment block.

    img_above/img_below are reflect-correct halo rows (C, 1, W) just above /
    below the block (None => single-block mode: derive them from the block
    itself, i.e. true reflect at rows 0 / TH-1).  Returns acc (TH, W) f32:
    sum over the 8 neighbor offsets of exp(-img_diff/sigma) * seg_diff.
    """
    _, th, w = img.shape

    ri = lax.broadcasted_iota(jnp.int32, (th, w), 0)
    ci = lax.broadcasted_iota(jnp.int32, (1, w), 1)
    row_first = ri == 0
    row_last = ri == th - 1
    col_first = ci == 0
    col_last = ci == w - 1

    def shift_w(x, dx):
        # Column neighbor with 1-px reflect at the true image border (W is
        # never tiled).  Two XLU rotates + one VPU select; no copies.  The
        # select also overwrites the wrap-around lane, so lane padding (W<128)
        # can never leak in.
        lane = x.ndim - 1
        rp = _roll(x, 1, lane)    # rp[..., j] = x[..., j-1]
        rm = _roll(x, -1, lane)   # rm[..., j] = x[..., j+1]
        if dx == -1:
            return jnp.where(col_first, rm, rp)   # col 0 reflects to col 1
        return jnp.where(col_last, rp, rm)        # col W-1 reflects to col W-2

    def shift_h(x, dy, fix):
        # Row neighbor; `fix` is the halo row used at the block boundary
        # (true adjacent row for interior tiles, reflect row at image edges).
        sub = x.ndim - 2
        if dy == -1:
            shifted = _roll(x, 1, sub)
            if fix is None:
                fix = _roll(x, -1, sub)           # row 0 reflects to row 1
            return jnp.where(row_first, fix, shifted)
        shifted = _roll(x, -1, sub)
        if fix is None:
            fix = _roll(x, 1, sub)                # row TH-1 reflects to TH-2
        return jnp.where(row_last, fix, shifted)

    acc = jnp.zeros((th, w), jnp.float32)
    for dx in (-1, 0, 1):
        if dx == 0:
            img_x, seg_x = img, seg
            ia_x, ib_x, sa_x, sb_x = img_above, img_below, seg_above, seg_below
        else:
            img_x, seg_x = shift_w(img, dx), shift_w(seg, dx)
            ia_x = None if img_above is None else shift_w(img_above, dx)
            ib_x = None if img_below is None else shift_w(img_below, dx)
            sa_x = None if seg_above is None else shift_w(seg_above, dx)
            sb_x = None if seg_below is None else shift_w(seg_below, dx)
        for dy in (-1, 0, 1):
            if dy == 0 and dx == 0:
                continue
            if dy == 0:
                n_img, n_seg = img_x, seg_x
            elif dy == -1:
                n_img = shift_h(img_x, -1, ia_x)
                n_seg = shift_h(seg_x, -1, sa_x)
            else:
                n_img = shift_h(img_x, 1, ib_x)
                n_seg = shift_h(seg_x, 1, sb_x)
            di = img - n_img                          # (C, TH, W)
            img_diff = jnp.sum(di * di, axis=0)       # (TH, W) sum over channels
            ds = seg - n_seg                          # (TH, W)
            acc = acc + jnp.exp(img_diff * neg_inv_sigma) * (ds * ds)
    return acc


def _make_tiled_kernel(neg_inv_sigma):
    """Grid (B, H//TH); 8-row halo blocks supply reflect-correct boundary rows."""

    def kernel(img_ref, seg_ref, iha_ref, ihb_ref, sha_ref, shb_ref, out_ref):
        hb = pl.program_id(1)
        is_top = hb == 0
        is_bottom = hb == pl.num_programs(1) - 1

        img = img_ref[...].astype(jnp.float32)     # (C, TH, W)
        seg = seg_ref[...].astype(jnp.float32)     # (TH, W)
        # Halo blocks hold 8 sublane-aligned rows; the needed row sits at index
        # 7 / 0 for interior tiles and at the reflect row 1 / 6 for the top /
        # bottom image edge (the index_map clamps the block there).
        img_above = jnp.where(is_top, iha_ref[:, 1:2, :],
                              iha_ref[:, 7:8, :]).astype(jnp.float32)
        img_below = jnp.where(is_bottom, ihb_ref[:, 6:7, :],
                              ihb_ref[:, 0:1, :]).astype(jnp.float32)
        seg_above = jnp.where(is_top, sha_ref[1:2, :],
                              sha_ref[7:8, :]).astype(jnp.float32)
        seg_below = jnp.where(is_bottom, shb_ref[6:7, :],
                              shb_ref[0:1, :]).astype(jnp.float32)

        acc = _accumulate(img, seg, img_above, img_below, seg_above, seg_below,
                          neg_inv_sigma)

        # Fold (TH, W) -> (8, W) with plain VPU adds over aligned 8-row slabs;
        # the cross-lane / cross-block reduction happens in the wrapper.
        part = acc[0:8]
        for r in range(8, acc.shape[0], 8):
            part = part + acc[r:r + 8]
        out_ref[...] = part

    return kernel


def _make_single_block_kernel(neg_inv_sigma):
    """Fallback (H not a multiple of 8): one block covers the whole H extent."""

    def kernel(img_ref, seg_ref, out_ref):
        img = img_ref[...].astype(jnp.float32)     # (C, H, W)
        seg = seg_ref[...].astype(jnp.float32)     # (H, W)
        acc = _accumulate(img, seg, None, None, None, None, neg_inv_sigma)
        out_ref[...] = jnp.sum(acc, axis=0, keepdims=True)   # (1, W)

    return kernel


def _choose_block_rows(C, H, W):
    # Target ~2 MiB of f32 image data per block: the in-kernel working set is a
    # small multiple of that, so double-buffered input DMAs plus temporaries
    # fit comfortably in scoped VMEM on every chip (incl. v7x's 64 MiB).
    target = 2 * 1024 * 1024
    rows = target // max(1, C * W * 4)
    rows = max(8, min(H, rows))
    rows -= rows % 8
    rows = max(8, rows)
    while H % rows != 0:          # terminates at 8 because H % 8 == 0 here
        rows -= 8
    return rows


def _vmem_limit_bytes():
    # ~3/4 of physical VMEM capped at 96 MiB: ~96 MiB on v5e/v6e (128 MiB
    # physical), ~48 MiB on v7x (64 MiB physical).  Safe fallback: 48 MiB.
    try:
        cap = int(pltpu.get_tpu_info().vmem_capacity_bytes)
        return max(32 * 1024 * 1024, min(cap * 3 // 4, 96 * 1024 * 1024))
    except Exception:
        return 48 * 1024 * 1024


def sempart_reg_loss(img, segment, sigma=1.0, block_rows=None):
    """img: (B, C, H, W), segment: (B, 1, H, W) -> scalar float32 loss."""
    B, C, H, W = img.shape
    assert segment.shape == (B, 1, H, W)
    assert H >= 2 and W >= 2, "reflect padding needs H, W >= 2"

    seg = segment.reshape(B, H, W)          # drop size-1 channel dim (metadata only)
    neg_inv_sigma = -1.0 / float(sigma)

    cost = pl.CostEstimate(
        flops=8 * B * H * W * (3 * C + 4),
        transcendentals=8 * B * H * W,
        bytes_accessed=int(img.size) * img.dtype.itemsize
        + B * H * W * segment.dtype.itemsize
        + 4 * B * ((H + 7) // 8) * W,
    )
    vmem_limit = _vmem_limit_bytes()

    if H % 8 == 0:
        th = int(block_rows) if block_rows is not None else _choose_block_rows(C, H, W)
        assert th % 8 == 0 and H % th == 0, "block_rows must divide H and be a multiple of 8"
        n_h = H // th
        th8 = th // 8           # H-tile size in units of 8-row halo blocks
        h8_last = H // 8 - 1    # index of the last 8-row block

        # 8-row block holding the row just above / below the tile, clamped at
        # the image border (where the kernel picks the in-block reflect row).
        above = lambda b, h: jnp.maximum(h * th8 - 1, 0)
        below = lambda b, h: jnp.minimum((h + 1) * th8, h8_last)

        partials = pl.pallas_call(
            _make_tiled_kernel(neg_inv_sigma),
            out_shape=jax.ShapeDtypeStruct((B, n_h, 8, W), jnp.float32),
            grid=(B, n_h),
            in_specs=[
                pl.BlockSpec((None, C, th, W), lambda b, h: (b, 0, h, 0)),
                pl.BlockSpec((None, th, W), lambda b, h: (b, h, 0)),
                pl.BlockSpec((None, C, 8, W), lambda b, h: (b, 0, above(b, h), 0)),
                pl.BlockSpec((None, C, 8, W), lambda b, h: (b, 0, below(b, h), 0)),
                pl.BlockSpec((None, 8, W), lambda b, h: (b, above(b, h), 0)),
                pl.BlockSpec((None, 8, W), lambda b, h: (b, below(b, h), 0)),
            ],
            out_specs=pl.BlockSpec((None, None, 8, W), lambda b, h: (b, h, 0, 0)),
            compiler_params=pltpu.CompilerParams(
                dimension_semantics=("parallel", "parallel"),
                vmem_limit_bytes=vmem_limit,
            ),
            cost_estimate=cost,
        )(img, seg, img, img, seg, seg)
    else:
        partials = pl.pallas_call(
            _make_single_block_kernel(neg_inv_sigma),
            out_shape=jax.ShapeDtypeStruct((B, 1, W), jnp.float32),
            grid=(B,),
            in_specs=[
                pl.BlockSpec((None, C, H, W), lambda b: (b, 0, 0, 0)),
                pl.BlockSpec((None, H, W), lambda b: (b, 0, 0)),
            ],
            out_specs=pl.BlockSpec((None, 1, W), lambda b: (b, 0, 0)),
            compiler_params=pltpu.CompilerParams(
                dimension_semantics=("parallel",),
                vmem_limit_bytes=vmem_limit,
            ),
            cost_estimate=cost,
        )(img, seg)

    return jnp.sum(partials) / float(B * 8 * H * W)


def _reference_loss(img, segment, sigma=1.0):
    """Pure-JAX reference (same math as the PyTorch module)."""
    B, C, H, W = img.shape
    img_p = jnp.pad(img.astype(jnp.float32),
                    ((0, 0), (0, 0), (1, 1), (1, 1)), mode="reflect")
    seg_p = jnp.pad(segment.astype(jnp.float32),
                    ((0, 0), (0, 0), (1, 1), (1, 1)), mode="reflect")
    total = jnp.float32(0.0)
    for (dy, dx) in _OFFSETS:
        cI = img_p[:, :, 1:1 + H, 1:1 + W]
        nI = img_p[:, :, 1 + dy:1 + dy + H, 1 + dx:1 + dx + W]
        cS = seg_p[:, :, 1:1 + H, 1:1 + W]
        nS = seg_p[:, :, 1 + dy:1 + dy + H, 1 + dx:1 + dx + W]
        idiff = jnp.sum((cI - nI) ** 2, axis=1)
        sdiff = jnp.sum((cS - nS) ** 2, axis=1)
        total = total + jnp.sum(jnp.exp(-idiff / sigma) * sdiff)
    return total / (B * 8 * H * W)


if __name__ == "__main__":
    key = jax.random.PRNGKey(0)
    k_img, k_seg = jax.random.split(key)
    B, C, H, W = 2, 3, 16, 16
    img = jax.random.normal(k_img, (B, C, H, W), dtype=jnp.float32)
    segment = jax.random.normal(k_seg, (B, 1, H, W), dtype=jnp.float32)

    ref = jax.block_until_ready(_reference_loss(img, segment, sigma=1.0))

    # Default tiling (one H block per batch element at this size).
    loss = jax.block_until_ready(sempart_reg_loss(img, segment, sigma=1.0))
    assert jnp.allclose(loss, ref, rtol=1e-4, atol=1e-6), (loss, ref)

    # Force H tiling (two 8-row tiles) to also exercise the inter-tile halos.
    loss_tiled = jax.block_until_ready(
        sempart_reg_loss(img, segment, sigma=1.0, block_rows=8))
    assert jnp.allclose(loss_tiled, ref, rtol=1e-4, atol=1e-6), (loss_tiled, ref)

    print("KERNEL_OK")
</pallas_src>

<mosaic_0001>
module attributes {stable_mosaic.version = 11 : i64} {
  func.func @kernel(%arg0: i32, %arg1: i32, %arg2: memref<1x3x16x16xf32, #tpu.memory_space<vmem>>, %arg3: memref<1x16x16xf32, #tpu.memory_space<vmem>>, %arg4: memref<1x3x8x16xf32, #tpu.memory_space<vmem>>, %arg5: memref<1x3x8x16xf32, #tpu.memory_space<vmem>>, %arg6: memref<1x8x16xf32, #tpu.memory_space<vmem>>, %arg7: memref<1x8x16xf32, #tpu.memory_space<vmem>>, %arg8: memref<1x1x8x16xf32, #tpu.memory_space<vmem>>) attributes {dimension_semantics = [#tpu.dimension_semantics<parallel>, #tpu.dimension_semantics<parallel>], iteration_bounds = array<i64: 2, 1>, scalar_prefetch = 0 : i64, scratch_operands = 0 : i64, tpu.core_type = #tpu.core_type<tc>, window_params = [{transform_indices = @transform_0, window_bounds = array<i64: 1, 3, 16, 16>}, {transform_indices = @transform_1, window_bounds = array<i64: 1, 16, 16>}, {transform_indices = @transform_2, window_bounds = array<i64: 1, 3, 8, 16>}, {transform_indices = @transform_3, window_bounds = array<i64: 1, 3, 8, 16>}, {transform_indices = @transform_4, window_bounds = array<i64: 1, 8, 16>}, {transform_indices = @transform_5, window_bounds = array<i64: 1, 8, 16>}, {transform_indices = @transform_6, window_bounds = array<i64: 1, 1, 8, 16>}]} {
    %c0_i32 = arith.constant 0 : i32
    %0 = arith.cmpi eq, %arg1, %c0_i32 : i32
    %c0_i32_0 = arith.constant 0 : i32
    %1 = arith.cmpi eq, %arg1, %c0_i32_0 : i32
    %c0 = arith.constant 0 : index
    %c0_1 = arith.constant 0 : index
    %c0_2 = arith.constant 0 : index
    %c0_3 = arith.constant 0 : index
    %2 = vector.load %arg2[%c0, %c0_1, %c0_2, %c0_3] : memref<1x3x16x16xf32, #tpu.memory_space<vmem>>, vector<1x3x16x16xf32>
    %3 = vector.shape_cast %2 : vector<1x3x16x16xf32> to vector<3x16x16xf32>
    %c0_4 = arith.constant 0 : index
    %c0_5 = arith.constant 0 : index
    %c0_6 = arith.constant 0 : index
    %4 = vector.load %arg3[%c0_4, %c0_5, %c0_6] : memref<1x16x16xf32, #tpu.memory_space<vmem>>, vector<1x16x16xf32>
    %5 = vector.shape_cast %4 : vector<1x16x16xf32> to vector<16x16xf32>
    %c0_7 = arith.constant 0 : index
    %c0_8 = arith.constant 0 : index
    %c1 = arith.constant 1 : index
    %c0_9 = arith.constant 0 : index
    %6 = vector.load %arg4[%c0_7, %c0_8, %c1, %c0_9] : memref<1x3x8x16xf32, #tpu.memory_space<vmem>>, vector<1x3x1x16xf32>
    %7 = vector.shape_cast %6 : vector<1x3x1x16xf32> to vector<3x1x16xf32>
    %c0_10 = arith.constant 0 : index
    %c0_11 = arith.constant 0 : index
    %c7 = arith.constant 7 : index
    %c0_12 = arith.constant 0 : index
    %8 = vector.load %arg4[%c0_10, %c0_11, %c7, %c0_12] : memref<1x3x8x16xf32, #tpu.memory_space<vmem>>, vector<1x3x1x16xf32>
    %9 = vector.shape_cast %8 : vector<1x3x1x16xf32> to vector<3x1x16xf32>
    %10 = arith.select %0, %7, %9 : vector<3x1x16xf32>
    %c0_13 = arith.constant 0 : index
    %c0_14 = arith.constant 0 : index
    %c6 = arith.constant 6 : index
    %c0_15 = arith.constant 0 : index
    %11 = vector.load %arg5[%c0_13, %c0_14, %c6, %c0_15] : memref<1x3x8x16xf32, #tpu.memory_space<vmem>>, vector<1x3x1x16xf32>
    %12 = vector.shape_cast %11 : vector<1x3x1x16xf32> to vector<3x1x16xf32>
    %c0_16 = arith.constant 0 : index
    %c0_17 = arith.constant 0 : index
    %c0_18 = arith.constant 0 : index
    %c0_19 = arith.constant 0 : index
    %13 = vector.load %arg5[%c0_16, %c0_17, %c0_18, %c0_19] : memref<1x3x8x16xf32, #tpu.memory_space<vmem>>, vector<1x3x1x16xf32>
    %14 = vector.shape_cast %13 : vector<1x3x1x16xf32> to vector<3x1x16xf32>
    %15 = arith.select %1, %12, %14 : vector<3x1x16xf32>
    %c0_20 = arith.constant 0 : index
    %c1_21 = arith.constant 1 : index
    %c0_22 = arith.constant 0 : index
    %16 = vector.load %arg6[%c0_20, %c1_21, %c0_22] : memref<1x8x16xf32, #tpu.memory_space<vmem>>, vector<1x1x16xf32>
    %17 = vector.shape_cast %16 : vector<1x1x16xf32> to vector<1x16xf32>
    %c0_23 = arith.constant 0 : index
    %c7_24 = arith.constant 7 : index
    %c0_25 = arith.constant 0 : index
    %18 = vector.load %arg6[%c0_23, %c7_24, %c0_25] : memref<1x8x16xf32, #tpu.memory_space<vmem>>, vector<1x1x16xf32>
    %19 = vector.shape_cast %18 : vector<1x1x16xf32> to vector<1x16xf32>
    %20 = arith.select %0, %17, %19 : vector<1x16xf32>
    %c0_26 = arith.constant 0 : index
    %c6_27 = arith.constant 6 : index
    %c0_28 = arith.constant 0 : index
    %21 = vector.load %arg7[%c0_26, %c6_27, %c0_28] : memref<1x8x16xf32, #tpu.memory_space<vmem>>, vector<1x1x16xf32>
    %22 = vector.shape_cast %21 : vector<1x1x16xf32> to vector<1x16xf32>
    %c0_29 = arith.constant 0 : index
    %c0_30 = arith.constant 0 : index
    %c0_31 = arith.constant 0 : index
    %23 = vector.load %arg7[%c0_29, %c0_30, %c0_31] : memref<1x8x16xf32, #tpu.memory_space<vmem>>, vector<1x1x16xf32>
    %24 = vector.shape_cast %23 : vector<1x1x16xf32> to vector<1x16xf32>
    %25 = arith.select %1, %22, %24 : vector<1x16xf32>
    %26 = tpu.iota {dimensions = array<i32: 0>} : vector<16x16xi32>
    %27 = tpu.iota {dimensions = array<i32: 1>} : vector<1x16xi32>
    %c0_i32_32 = arith.constant 0 : i32
    %28 = vector.broadcast %c0_i32_32 : i32 to vector<16x16xi32>
    %29 = arith.cmpi eq, %26, %28 : vector<16x16xi32>
    %c15_i32 = arith.constant 15 : i32
    %30 = vector.broadcast %c15_i32 : i32 to vector<16x16xi32>
    %31 = arith.cmpi eq, %26, %30 : vector<16x16xi32>
    %c0_i32_33 = arith.constant 0 : i32
    %32 = vector.broadcast %c0_i32_33 : i32 to vector<1x16xi32>
    %33 = arith.cmpi eq, %27, %32 : vector<1x16xi32>
    %c15_i32_34 = arith.constant 15 : i32
    %34 = vector.broadcast %c15_i32_34 : i32 to vector<1x16xi32>
    %35 = arith.cmpi eq, %27, %34 : vector<1x16xi32>
    %cst = arith.constant 0.000000e+00 : f32
    %36 = vector.broadcast %cst : f32 to vector<16x16xf32>
    %c1_i32 = arith.constant 1 : i32
    %37 = tpu.dynamic_rotate %3 by %c1_i32 dim 2 : vector<3x16x16xf32>, i32 -> vector<3x16x16xf32>
    %c15_i32_35 = arith.constant 15 : i32
    %38 = tpu.dynamic_rotate %3 by %c15_i32_35 dim 2 : vector<3x16x16xf32>, i32 -> vector<3x16x16xf32>
    %39 = vector.shape_cast %33 : vector<1x16xi1> to vector<1x1x16xi1>
    %40 = vector.broadcast %39 : vector<1x1x16xi1> to vector<3x16x16xi1>
    %41 = arith.select %40, %38, %37 : vector<3x16x16xi1>, vector<3x16x16xf32>
    %c1_i32_36 = arith.constant 1 : i32
    %42 = tpu.dynamic_rotate %5 by %c1_i32_36 dim 1 : vector<16x16xf32>, i32 -> vector<16x16xf32>
    %c15_i32_37 = arith.constant 15 : i32
    %43 = tpu.dynamic_rotate %5 by %c15_i32_37 dim 1 : vector<16x16xf32>, i32 -> vector<16x16xf32>
    %44 = vector.shape_cast %33 : vector<1x16xi1> to vector<1x16xi1>
    %45 = vector.broadcast %44 : vector<1x16xi1> to vector<16x16xi1>
    %46 = arith.select %45, %43, %42 : vector<16x16xi1>, vector<16x16xf32>
    %c1_i32_38 = arith.constant 1 : i32
    %47 = tpu.dynamic_rotate %10 by %c1_i32_38 dim 2 : vector<3x1x16xf32>, i32 -> vector<3x1x16xf32>
    %c15_i32_39 = arith.constant 15 : i32
    %48 = tpu.dynamic_rotate %10 by %c15_i32_39 dim 2 : vector<3x1x16xf32>, i32 -> vector<3x1x16xf32>
    %49 = vector.shape_cast %33 : vector<1x16xi1> to vector<1x1x16xi1>
    %50 = vector.broadcast %49 : vector<1x1x16xi1> to vector<3x1x16xi1>
    %51 = arith.select %50, %48, %47 : vector<3x1x16xi1>, vector<3x1x16xf32>
    %c1_i32_40 = arith.constant 1 : i32
    %52 = tpu.dynamic_rotate %15 by %c1_i32_40 dim 2 : vector<3x1x16xf32>, i32 -> vector<3x1x16xf32>
    %c15_i32_41 = arith.constant 15 : i32
    %53 = tpu.dynamic_rotate %15 by %c15_i32_41 dim 2 : vector<3x1x16xf32>, i32 -> vector<3x1x16xf32>
    %54 = vector.shape_cast %33 : vector<1x16xi1> to vector<1x1x16xi1>
    %55 = vector.broadcast %54 : vector<1x1x16xi1> to vector<3x1x16xi1>
    %56 = arith.select %55, %53, %52 : vector<3x1x16xi1>, vector<3x1x16xf32>
    %c1_i32_42 = arith.constant 1 : i32
    %57 = tpu.dynamic_rotate %20 by %c1_i32_42 dim 1 : vector<1x16xf32>, i32 -> vector<1x16xf32>
    %c15_i32_43 = arith.constant 15 : i32
    %58 = tpu.dynamic_rotate %20 by %c15_i32_43 dim 1 : vector<1x16xf32>, i32 -> vector<1x16xf32>
    %59 = arith.select %33, %58, %57 : vector<1x16xi1>, vector<1x16xf32>
    %c1_i32_44 = arith.constant 1 : i32
    %60 = tpu.dynamic_rotate %25 by %c1_i32_44 dim 1 : vector<1x16xf32>, i32 -> vector<1x16xf32>
    %c15_i32_45 = arith.constant 15 : i32
    %61 = tpu.dynamic_rotate %25 by %c15_i32_45 dim 1 : vector<1x16xf32>, i32 -> vector<1x16xf32>
    %62 = arith.select %33, %61, %60 : vector<1x16xi1>, vector<1x16xf32>
    %c1_i32_46 = arith.constant 1 : i32
    %63 = tpu.dynamic_rotate %41 by %c1_i32_46 dim 1 : vector<3x16x16xf32>, i32 -> vector<3x16x16xf32>
    %64 = vector.shape_cast %29 : vector<16x16xi1> to vector<1x16x16xi1>
    %65 = vector.broadcast %64 : vector<1x16x16xi1> to vector<3x16x16xi1>
    %66 = vector.shape_cast %51 : vector<3x1x16xf32> to vector<3x1x16xf32>
    %67 = vector.broadcast %66 : vector<3x1x16xf32> to vector<3x16x16xf32>
    %68 = arith.select %65, %67, %63 : vector<3x16x16xi1>, vector<3x16x16xf32>
    %c1_i32_47 = arith.constant 1 : i32
    %69 = tpu.dynamic_rotate %46 by %c1_i32_47 dim 0 : vector<16x16xf32>, i32 -> vector<16x16xf32>
    %70 = vector.shape_cast %59 : vector<1x16xf32> to vector<1x16xf32>
    %71 = vector.broadcast %70 : vector<1x16xf32> to vector<16x16xf32>
    %72 = arith.select %29, %71, %69 : vector<16x16xi1>, vector<16x16xf32>
    %73 = arith.subf %3, %68 : vector<3x16x16xf32>
    %74 = arith.mulf %73, %73 : vector<3x16x16xf32>
    %cst_48 = arith.constant dense<0.000000e+00> : vector<16x16xf32>
    %75 = vector.multi_reduction <add>, %74, %cst_48 [0] : vector<3x16x16xf32> to vector<16x16xf32>
    %76 = arith.subf %5, %72 : vector<16x16xf32>
    %cst_49 = arith.constant -1.000000e+00 : f32
    %77 = vector.broadcast %cst_49 : f32 to vector<16x16xf32>
    %78 = arith.mulf %75, %77 : vector<16x16xf32>
    %79 = math.exp %78 : vector<16x16xf32>
    %80 = arith.mulf %76, %76 : vector<16x16xf32>
    %81 = arith.mulf %79, %80 : vector<16x16xf32>
    %82 = arith.addf %36, %81 : vector<16x16xf32>
    %83 = arith.subf %3, %41 : vector<3x16x16xf32>
    %84 = arith.mulf %83, %83 : vector<3x16x16xf32>
    %cst_50 = arith.constant dense<0.000000e+00> : vector<16x16xf32>
    %85 = vector.multi_reduction <add>, %84, %cst_50 [0] : vector<3x16x16xf32> to vector<16x16xf32>
    %86 = arith.subf %5, %46 : vector<16x16xf32>
    %cst_51 = arith.constant -1.000000e+00 : f32
    %87 = vector.broadcast %cst_51 : f32 to vector<16x16xf32>
    %88 = arith.mulf %85, %87 : vector<16x16xf32>
    %89 = math.exp %88 : vector<16x16xf32>
    %90 = arith.mulf %86, %86 : vector<16x16xf32>
    %91 = arith.mulf %89, %90 : vector<16x16xf32>
    %92 = arith.addf %82, %91 : vector<16x16xf32>
    %c15_i32_52 = arith.constant 15 : i32
    %93 = tpu.dynamic_rotate %41 by %c15_i32_52 dim 1 : vector<3x16x16xf32>, i32 -> vector<3x16x16xf32>
    %94 = vector.shape_cast %31 : vector<16x16xi1> to vector<1x16x16xi1>
    %95 = vector.broadcast %94 : vector<1x16x16xi1> to vector<3x16x16xi1>
    %96 = vector.shape_cast %56 : vector<3x1x16xf32> to vector<3x1x16xf32>
    %97 = vector.broadcast %96 : vector<3x1x16xf32> to vector<3x16x16xf32>
    %98 = arith.select %95, %97, %93 : vector<3x16x16xi1>, vector<3x16x16xf32>
    %c15_i32_53 = arith.constant 15 : i32
    %99 = tpu.dynamic_rotate %46 by %c15_i32_53 dim 0 : vector<16x16xf32>, i32 -> vector<16x16xf32>
    %100 = vector.shape_cast %62 : vector<1x16xf32> to vector<1x16xf32>
    %101 = vector.broadcast %100 : vector<1x16xf32> to vector<16x16xf32>
    %102 = arith.select %31, %101, %99 : vector<16x16xi1>, vector<16x16xf32>
    %103 = arith.subf %3, %98 : vector<3x16x16xf32>
    %104 = arith.mulf %103, %103 : vector<3x16x16xf32>
    %cst_54 = arith.constant dense<0.000000e+00> : vector<16x16xf32>
    %105 = vector.multi_reduction <add>, %104, %cst_54 [0] : vector<3x16x16xf32> to vector<16x16xf32>
    %106 = arith.subf %5, %102 : vector<16x16xf32>
    %cst_55 = arith.constant -1.000000e+00 : f32
    %107 = vector.broadcast %cst_55 : f32 to vector<16x16xf32>
    %108 = arith.mulf %105, %107 : vector<16x16xf32>
    %109 = math.exp %108 : vector<16x16xf32>
    %110 = arith.mulf %106, %106 : vector<16x16xf32>
    %111 = arith.mulf %109, %110 : vector<16x16xf32>
    %112 = arith.addf %92, %111 : vector<16x16xf32>
    %c1_i32_56 = arith.constant 1 : i32
    %113 = tpu.dynamic_rotate %3 by %c1_i32_56 dim 1 : vector<3x16x16xf32>, i32 -> vector<3x16x16xf32>
    %114 = vector.shape_cast %29 : vector<16x16xi1> to vector<1x16x16xi1>
    %115 = vector.broadcast %114 : vector<1x16x16xi1> to vector<3x16x16xi1>
    %116 = vector.shape_cast %10 : vector<3x1x16xf32> to vector<3x1x16xf32>
    %117 = vector.broadcast %116 : vector<3x1x16xf32> to vector<3x16x16xf32>
    %118 = arith.select %115, %117, %113 : vector<3x16x16xi1>, vector<3x16x16xf32>
    %c1_i32_57 = arith.constant 1 : i32
    %119 = tpu.dynamic_rotate %5 by %c1_i32_57 dim 0 : vector<16x16xf32>, i32 -> vector<16x16xf32>
    %120 = vector.shape_cast %20 : vector<1x16xf32> to vector<1x16xf32>
    %121 = vector.broadcast %120 : vector<1x16xf32> to vector<16x16xf32>
    %122 = arith.select %29, %121, %119 : vector<16x16xi1>, vector<16x16xf32>
    %123 = arith.subf %3, %118 : vector<3x16x16xf32>
    %124 = arith.mulf %123, %123 : vector<3x16x16xf32>
    %cst_58 = arith.constant dense<0.000000e+00> : vector<16x16xf32>
    %125 = vector.multi_reduction <add>, %124, %cst_58 [0] : vector<3x16x16xf32> to vector<16x16xf32>
    %126 = arith.subf %5, %122 : vector<16x16xf32>
    %cst_59 = arith.constant -1.000000e+00 : f32
    %127 = vector.broadcast %cst_59 : f32 to vector<16x16xf32>
    %128 = arith.mulf %125, %127 : vector<16x16xf32>
    %129 = math.exp %128 : vector<16x16xf32>
    %130 = arith.mulf %126, %126 : vector<16x16xf32>
    %131 = arith.mulf %129, %130 : vector<16x16xf32>
    %132 = arith.addf %112, %131 : vector<16x16xf32>
    %c15_i32_60 = arith.constant 15 : i32
    %133 = tpu.dynamic_rotate %3 by %c15_i32_60 dim 1 : vector<3x16x16xf32>, i32 -> vector<3x16x16xf32>
    %134 = vector.shape_cast %31 : vector<16x16xi1> to vector<1x16x16xi1>
    %135 = vector.broadcast %134 : vector<1x16x16xi1> to vector<3x16x16xi1>
    %136 = vector.shape_cast %15 : vector<3x1x16xf32> to vector<3x1x16xf32>
    %137 = vector.broadcast %136 : vector<3x1x16xf32> to vector<3x16x16xf32>
    %138 = arith.select %135, %137, %133 : vector<3x16x16xi1>, vector<3x16x16xf32>
    %c15_i32_61 = arith.constant 15 : i32
    %139 = tpu.dynamic_rotate %5 by %c15_i32_61 dim 0 : vector<16x16xf32>, i32 -> vector<16x16xf32>
    %140 = vector.shape_cast %25 : vector<1x16xf32> to vector<1x16xf32>
    %141 = vector.broadcast %140 : vector<1x16xf32> to vector<16x16xf32>
    %142 = arith.select %31, %141, %139 : vector<16x16xi1>, vector<16x16xf32>
    %143 = arith.subf %3, %138 : vector<3x16x16xf32>
    %144 = arith.mulf %143, %143 : vector<3x16x16xf32>
    %cst_62 = arith.constant dense<0.000000e+00> : vector<16x16xf32>
    %145 = vector.multi_reduction <add>, %144, %cst_62 [0] : vector<3x16x16xf32> to vector<16x16xf32>
    %146 = arith.subf %5, %142 : vector<16x16xf32>
    %cst_63 = arith.constant -1.000000e+00 : f32
    %147 = vector.broadcast %cst_63 : f32 to vector<16x16xf32>
    %148 = arith.mulf %145, %147 : vector<16x16xf32>
    %149 = math.exp %148 : vector<16x16xf32>
    %150 = arith.mulf %146, %146 : vector<16x16xf32>
    %151 = arith.mulf %149, %150 : vector<16x16xf32>
    %152 = arith.addf %132, %151 : vector<16x16xf32>
    %c1_i32_64 = arith.constant 1 : i32
    %153 = tpu.dynamic_rotate %3 by %c1_i32_64 dim 2 : vector<3x16x16xf32>, i32 -> vector<3x16x16xf32>
    %c15_i32_65 = arith.constant 15 : i32
    %154 = tpu.dynamic_rotate %3 by %c15_i32_65 dim 2 : vector<3x16x16xf32>, i32 -> vector<3x16x16xf32>
    %155 = vector.shape_cast %35 : vector<1x16xi1> to vector<1x1x16xi1>
    %156 = vector.broadcast %155 : vector<1x1x16xi1> to vector<3x16x16xi1>
    %157 = arith.select %156, %153, %154 : vector<3x16x16xi1>, vector<3x16x16xf32>
    %c1_i32_66 = arith.constant 1 : i32
    %158 = tpu.dynamic_rotate %5 by %c1_i32_66 dim 1 : vector<16x16xf32>, i32 -> vector<16x16xf32>
    %c15_i32_67 = arith.constant 15 : i32
    %159 = tpu.dynamic_rotate %5 by %c15_i32_67 dim 1 : vector<16x16xf32>, i32 -> vector<16x16xf32>
    %160 = vector.shape_cast %35 : vector<1x16xi1> to vector<1x16xi1>
    %161 = vector.broadcast %160 : vector<1x16xi1> to vector<16x16xi1>
    %162 = arith.select %161, %158, %159 : vector<16x16xi1>, vector<16x16xf32>
    %c1_i32_68 = arith.constant 1 : i32
    %163 = tpu.dynamic_rotate %10 by %c1_i32_68 dim 2 : vector<3x1x16xf32>, i32 -> vector<3x1x16xf32>
    %c15_i32_69 = arith.constant 15 : i32
    %164 = tpu.dynamic_rotate %10 by %c15_i32_69 dim 2 : vector<3x1x16xf32>, i32 -> vector<3x1x16xf32>
    %165 = vector.shape_cast %35 : vector<1x16xi1> to vector<1x1x16xi1>
    %166 = vector.broadcast %165 : vector<1x1x16xi1> to vector<3x1x16xi1>
    %167 = arith.select %166, %163, %164 : vector<3x1x16xi1>, vector<3x1x16xf32>
    %c1_i32_70 = arith.constant 1 : i32
    %168 = tpu.dynamic_rotate %15 by %c1_i32_70 dim 2 : vector<3x1x16xf32>, i32 -> vector<3x1x16xf32>
    %c15_i32_71 = arith.constant 15 : i32
    %169 = tpu.dynamic_rotate %15 by %c15_i32_71 dim 2 : vector<3x1x16xf32>, i32 -> vector<3x1x16xf32>
    %170 = vector.shape_cast %35 : vector<1x16xi1> to vector<1x1x16xi1>
    %171 = vector.broadcast %170 : vector<1x1x16xi1> to vector<3x1x16xi1>
    %172 = arith.select %171, %168, %169 : vector<3x1x16xi1>, vector<3x1x16xf32>
    %c1_i32_72 = arith.constant 1 : i32
    %173 = tpu.dynamic_rotate %20 by %c1_i32_72 dim 1 : vector<1x16xf32>, i32 -> vector<1x16xf32>
    %c15_i32_73 = arith.constant 15 : i32
    %174 = tpu.dynamic_rotate %20 by %c15_i32_73 dim 1 : vector<1x16xf32>, i32 -> vector<1x16xf32>
    %175 = arith.select %35, %173, %174 : vector<1x16xi1>, vector<1x16xf32>
    %c1_i32_74 = arith.constant 1 : i32
    %176 = tpu.dynamic_rotate %25 by %c1_i32_74 dim 1 : vector<1x16xf32>, i32 -> vector<1x16xf32>
    %c15_i32_75 = arith.constant 15 : i32
    %177 = tpu.dynamic_rotate %25 by %c15_i32_75 dim 1 : vector<1x16xf32>, i32 -> vector<1x16xf32>
    %178 = arith.select %35, %176, %177 : vector<1x16xi1>, vector<1x16xf32>
    %c1_i32_76 = arith.constant 1 : i32
    %179 = tpu.dynamic_rotate %157 by %c1_i32_76 dim 1 : vector<3x16x16xf32>, i32 -> vector<3x16x16xf32>
    %180 = vector.shape_cast %29 : vector<16x16xi1> to vector<1x16x16xi1>
    %181 = vector.broadcast %180 : vector<1x16x16xi1> to vector<3x16x16xi1>
    %182 = vector.shape_cast %167 : vector<3x1x16xf32> to vector<3x1x16xf32>
    %183 = vector.broadcast %182 : vector<3x1x16xf32> to vector<3x16x16xf32>
    %184 = arith.select %181, %183, %179 : vector<3x16x16xi1>, vector<3x16x16xf32>
    %c1_i32_77 = arith.constant 1 : i32
    %185 = tpu.dynamic_rotate %162 by %c1_i32_77 dim 0 : vector<16x16xf32>, i32 -> vector<16x16xf32>
    %186 = vector.shape_cast %175 : vector<1x16xf32> to vector<1x16xf32>
    %187 = vector.broadcast %186 : vector<1x16xf32> to vector<16x16xf32>
    %188 = arith.select %29, %187, %185 : vector<16x16xi1>, vector<16x16xf32>
    %189 = arith.subf %3, %184 : vector<3x16x16xf32>
    %190 = arith.mulf %189, %189 : vector<3x16x16xf32>
    %cst_78 = arith.constant dense<0.000000e+00> : vector<16x16xf32>
    %191 = vector.multi_reduction <add>, %190, %cst_78 [0] : vector<3x16x16xf32> to vector<16x16xf32>
    %192 = arith.subf %5, %188 : vector<16x16xf32>
    %cst_79 = arith.constant -1.000000e+00 : f32
    %193 = vector.broadcast %cst_79 : f32 to vector<16x16xf32>
    %194 = arith.mulf %191, %193 : vector<16x16xf32>
    %195 = math.exp %194 : vector<16x16xf32>
    %196 = arith.mulf %192, %192 : vector<16x16xf32>
    %197 = arith.mulf %195, %196 : vector<16x16xf32>
    %198 = arith.addf %152, %197 : vector<16x16xf32>
    %199 = arith.subf %3, %157 : vector<3x16x16xf32>
    %200 = arith.mulf %199, %199 : vector<3x16x16xf32>
    %cst_80 = arith.constant dense<0.000000e+00> : vector<16x16xf32>
    %201 = vector.multi_reduction <add>, %200, %cst_80 [0] : vector<3x16x16xf32> to vector<16x16xf32>
    %202 = arith.subf %5, %162 : vector<16x16xf32>
    %cst_81 = arith.constant -1.000000e+00 : f32
    %203 = vector.broadcast %cst_81 : f32 to vector<16x16xf32>
    %204 = arith.mulf %201, %203 : vector<16x16xf32>
    %205 = math.exp %204 : vector<16x16xf32>
    %206 = arith.mulf %202, %202 : vector<16x16xf32>
    %207 = arith.mulf %205, %206 : vector<16x16xf32>
    %208 = arith.addf %198, %207 : vector<16x16xf32>
    %c15_i32_82 = arith.constant 15 : i32
    %209 = tpu.dynamic_rotate %157 by %c15_i32_82 dim 1 : vector<3x16x16xf32>, i32 -> vector<3x16x16xf32>
    %210 = vector.shape_cast %31 : vector<16x16xi1> to vector<1x16x16xi1>
    %211 = vector.broadcast %210 : vector<1x16x16xi1> to vector<3x16x16xi1>
    %212 = vector.shape_cast %172 : vector<3x1x16xf32> to vector<3x1x16xf32>
    %213 = vector.broadcast %212 : vector<3x1x16xf32> to vector<3x16x16xf32>
    %214 = arith.select %211, %213, %209 : vector<3x16x16xi1>, vector<3x16x16xf32>
    %c15_i32_83 = arith.constant 15 : i32
    %215 = tpu.dynamic_rotate %162 by %c15_i32_83 dim 0 : vector<16x16xf32>, i32 -> vector<16x16xf32>
    %216 = vector.shape_cast %178 : vector<1x16xf32> to vector<1x16xf32>
    %217 = vector.broadcast %216 : vector<1x16xf32> to vector<16x16xf32>
    %218 = arith.select %31, %217, %215 : vector<16x16xi1>, vector<16x16xf32>
    %219 = arith.subf %3, %214 : vector<3x16x16xf32>
    %220 = arith.mulf %219, %219 : vector<3x16x16xf32>
    %cst_84 = arith.constant dense<0.000000e+00> : vector<16x16xf32>
    %221 = vector.multi_reduction <add>, %220, %cst_84 [0] : vector<3x16x16xf32> to vector<16x16xf32>
    %222 = arith.subf %5, %218 : vector<16x16xf32>
    %cst_85 = arith.constant -1.000000e+00 : f32
    %223 = vector.broadcast %cst_85 : f32 to vector<16x16xf32>
    %224 = arith.mulf %221, %223 : vector<16x16xf32>
    %225 = math.exp %224 : vector<16x16xf32>
    %226 = arith.mulf %222, %222 : vector<16x16xf32>
    %227 = arith.mulf %225, %226 : vector<16x16xf32>
    %228 = arith.addf %208, %227 : vector<16x16xf32>
    %229 = vector.extract_strided_slice %228 {offsets = [0, 0], sizes = [8, 16], strides = [1, 1]} : vector<16x16xf32> to vector<8x16xf32>
    %230 = vector.extract_strided_slice %228 {offsets = [8, 0], sizes = [8, 16], strides = [1, 1]} : vector<16x16xf32> to vector<8x16xf32>
    %231 = arith.addf %229, %230 : vector<8x16xf32>
    %c0_86 = arith.constant 0 : index
    %c0_87 = arith.constant 0 : index
    %c0_88 = arith.constant 0 : index
    %c0_89 = arith.constant 0 : index
    %232 = vector.load %arg8[%c0_86, %c0_87, %c0_88, %c0_89] : memref<1x1x8x16xf32, #tpu.memory_space<vmem>>, vector<1x1x8x16xf32>
    %233 = vector.shape_cast %232 : vector<1x1x8x16xf32> to vector<8x16xf32>
    %234 = vector.shape_cast %231 : vector<8x16xf32> to vector<1x1x8x16xf32>
    tpu.vector_store %arg8[%c0_86, %c0_87, %c0_88, %c0_89], %234 {strides = array<i32>} : memref<1x1x8x16xf32, #tpu.memory_space<vmem>>, vector<1x1x8x16xf32>,
    return
  }
  func.func @transform_0(%arg0: i32, %arg1: i32) -> (i32, i32, i32, i32) {
    %c0_i32 = arith.constant 0 : i32
    %c0_i32_0 = arith.constant 0 : i32
    %c0_i32_1 = arith.constant 0 : i32
    return %arg0, %c0_i32, %arg1, %c0_i32_0 : i32, i32, i32, i32
  }
  func.func @transform_1(%arg0: i32, %arg1: i32) -> (i32, i32, i32) {
    %c0_i32 = arith.constant 0 : i32
    %c0_i32_0 = arith.constant 0 : i32
    return %arg0, %arg1, %c0_i32 : i32, i32, i32
  }
  func.func @transform_2(%arg0: i32, %arg1: i32) -> (i32, i32, i32, i32) {
    %c2_i32 = arith.constant 2 : i32
    %0 = arith.muli %arg1, %c2_i32 : i32
    %c1_i32 = arith.constant 1 : i32
    %1 = arith.subi %0, %c1_i32 : i32
    %c0_i32 = arith.constant 0 : i32
    %2 = arith.maxsi %1, %c0_i32 : i32
    %c0_i32_0 = arith.constant 0 : i32
    %c0_i32_1 = arith.constant 0 : i32
    %c0_i32_2 = arith.constant 0 : i32
    return %arg0, %c0_i32_0, %2, %c0_i32_1 : i32, i32, i32, i32
  }
  func.func @transform_3(%arg0: i32, %arg1: i32) -> (i32, i32, i32, i32) {
    %c1_i32 = arith.constant 1 : i32
    %0 = arith.addi %arg1, %c1_i32 : i32
    %c2_i32 = arith.constant 2 : i32
    %1 = arith.muli %0, %c2_i32 : i32
    %c1_i32_0 = arith.constant 1 : i32
    %2 = arith.minsi %1, %c1_i32_0 : i32
    %c0_i32 = arith.constant 0 : i32
    %c0_i32_1 = arith.constant 0 : i32
    %c0_i32_2 = arith.constant 0 : i32
    return %arg0, %c0_i32, %2, %c0_i32_1 : i32, i32, i32, i32
  }
  func.func @transform_4(%arg0: i32, %arg1: i32) -> (i32, i32, i32) {
    %c2_i32 = arith.constant 2 : i32
    %0 = arith.muli %arg1, %c2_i32 : i32
    %c1_i32 = arith.constant 1 : i32
    %1 = arith.subi %0, %c1_i32 : i32
    %c0_i32 = arith.constant 0 : i32
    %2 = arith.maxsi %1, %c0_i32 : i32
    %c0_i32_0 = arith.constant 0 : i32
    %c0_i32_1 = arith.constant 0 : i32
    return %arg0, %2, %c0_i32_0 : i32, i32, i32
  }
  func.func @transform_5(%arg0: i32, %arg1: i32) -> (i32, i32, i32) {
    %c1_i32 = arith.constant 1 : i32
    %0 = arith.addi %arg1, %c1_i32 : i32
    %c2_i32 = arith.constant 2 : i32
    %1 = arith.muli %0, %c2_i32 : i32
    %c1_i32_0 = arith.constant 1 : i32
    %2 = arith.minsi %1, %c1_i32_0 : i32
    %c0_i32 = arith.constant 0 : i32
    %c0_i32_1 = arith.constant 0 : i32
    return %arg0, %2, %c0_i32 : i32, i32, i32
  }
  func.func @transform_6(%arg0: i32, %arg1: i32) -> (i32, i32, i32, i32) {
    %c0_i32 = arith.constant 0 : i32
    %c0_i32_0 = arith.constant 0 : i32
    %c0_i32_1 = arith.constant 0 : i32
    return %arg0, %arg1, %c0_i32, %c0_i32_0 : i32, i32, i32, i32
  }
}

</mosaic_0001>

<bundles_post_ra>
// kernel: tpu_custom_call.1
= control target key start
LH: loop header
LB: loop body
LE: loop exit
PB: predicated region body
PF: predicated region fallthrough
CT: control target
= control target key end

     0   :  { %s3262_s0 = inlined_call_operand.hbm [shape: f32[2,3,16,16], index: 0, kind: input, shape index: {}]   ;;  %s3263_s1 = inlined_call_operand.hbm [shape: f32[2,16,16], index: 1, kind: input, shape index: {}]   ;;  %s3264_s2 = inlined_call_operand.hbm [shape: f32[2,3,16,16], index: 2, kind: input, shape index: {}]   ;;  %s3265_s3 = inlined_call_operand.hbm [shape: f32[2,3,16,16], index: 3, kind: input, shape index: {}]   ;;  %s3266_s4 = inlined_call_operand.hbm [shape: f32[2,16,16], index: 4, kind: input, shape index: {}]   ;;  %s3267_s5 = inlined_call_operand.hbm [shape: f32[2,16,16], index: 5, kind: input, shape index: {}]   ;;  %s3268_s6 = inlined_call_operand.hbm [shape: f32[2,1,8,16], index: 6, kind: output, shape index: {}]  }
   0x1   :  { %3290 = sst [smem:[#allocation28_spill]] %s3263_s1 }
   0x2   :  { %3291 = sst [smem:[#allocation29_spill]] %s3265_s3 }
   0x3   :  { %3292 = sst [smem:[#allocation30_spill]] %s3268_s6 }
   0x4   :  { %11 = vsyncpa [#allocation3], 0 }
   0x5   :  { %13 = vsyncpa [#allocation3 + $0x1], 0 }
   0x6   :  { %14 = vsyncpa [#allocation6], 0 }
   0x7   :  { %16 = vsyncpa [#allocation6 + $0x1], 0 }
   0x8   :  { %17 = vsyncpa [#allocation9], 0 }
   0x9   :  { %19 = vsyncpa [#allocation9 + $0x1], 0 }
   0xa   :  { %20 = vsyncpa [#allocation12], 0 }
   0xb   :  { %22 = vsyncpa [#allocation12 + $0x1], 0 }
   0xc   :  { %23 = vsyncpa [#allocation4], 0 }
   0xd   :  { %25 = vsyncpa [#allocation4 + $0x1], 0  ;;  %s2104_s21 = smov 0   ;;  %s2106_s22 = smov 0  }
   0xe   :  { %s2108_s23 = smov 0   ;;  %s2110_s24 = smov 0  }
   0xf   :  { %s2112_s25 = smov 0   ;;  %s2114_s26 = smov 0  }
  0x10 LB: > { %3293 = sst [smem:[#allocation19_spill]] %s2034_s21  ;;  %s2135_s27 = sadd.s32 4294967295, %s2054_s26   ;;  %s2054_s26 = sphi %s2114_s26, %s31_s26   ;;  %s2050_s25 = sphi %s2112_s25, %s3332_s25   ;;  %s2046_s24 = sphi %s2110_s24, %s3331_s24   ;;  %s2042_s23 = sphi %s2108_s23, %s3330_s23   ;;  %s2038_s22 = sphi %s2106_s22, %s3334_s22   ;;  %s2034_s21 = sphi %s2104_s21, %s3333_s21  }
  0x11   : > { %3294 = sst [smem:[#allocation20_spill]] %s2042_s23  ;;  %s1611_s28 = sadd.s32 4294967294, %s2054_s26  }
  0x12   : > { %3295 = sst [smem:[#allocation21_spill]] %s2046_s24  ;;  %s43_s29 = sadd.s32 1, %s2050_s25 }
  0x13   : > { %3296 = sst [smem:[#allocation22_spill]] %s2050_s25  ;;  %s52_s30 = sadd.s32 1, %s2042_s23 }
  0x14   : > { %3297 = sst [smem:[#allocation23_spill]] %s2054_s26  ;;  %p45_p0 = scmp.ge.s32.totalorder %s43_s29, 2 }
  0x15   : > { %p59_p1 = scmp.ne.s32.totalorder %s2042_s23, %s2038_s22  ;;  %p60_p2 = scmp.eq.s32.totalorder %s2054_s26, 0 }
  0x16   : > { %p65_p3 = scmp.ne.s32.totalorder %s2038_s22, %s2034_s21  ;;  %s3336_s29 = smov (%p45_p0, %s43_s29), 0 }
  0x17   : > { %3298 = sst [smem:[#allocation24_spill]] %s3336_s29  ;;  %p2147_p4 = por %p60_p2, %p59_p1 }
  0x18   : > { %p66_p5 = scmp.eq.s32.totalorder %s2135_s27, 0  ;;  %s47_s8 = ssub.s32 %s2050_s25, %s3336_s29 }
  0x19   : > { %p263_p6 = scmp.eq.s32.totalorder %s2135_s27, 1  ;;  %p50_p7 = scmp.eq.s32.totalorder %s47_s8, 0 }
  0x1a   : > { %p2155_p8 = por %p66_p5, %p65_p3  ;;  %p269_p10 = scmp.eq.s32.totalorder %s1611_s28, 1 }
  0x1b   : > { %p2159_p9 = por %p263_p6, %p59_p1  ;;  %p1687_p13 = scmp.lt.s32.totalorder %s2054_s26, 2 }
  0x1c   : > { %s3300_s9 = scalar_select %p2155_p8, 1, 0 }
  0x1d   : > { %s3301_s10 = scalar_select %p2159_p9, 1, 0 }
  0x1e   : > { %s2164_s11 = scalar_select %p50_p7, %s2042_s23, %s52_s30  }
  0x1f   : > { %3302 = sst [smem:[#allocation25_spill]] %s3301_s10  ;;  %p2166_p11 = por %p269_p10, %p65_p3 }
  0x20   : > { %3303 = sst [smem:[#allocation26_spill]] %s2164_s11  ;;  %s2173_s13 = sand.u32 1, %s2042_s23  }
  0x21   : > { %s3304_s12 = scalar_select %p2166_p11, 1, 0 }
  0x22   : > { %p2177_p0 = pnand %p1687_p13, %p2147_p4  ;;  %s3270_s15 = sand.u32 1, %s2054_s26  }
  0x23   : > { %3305 = sst [smem:[#allocation27_spill]] %s3304_s12  ;;  %s1615_s16 = sshll.u32 %s2173_s13, 4 }
  0x24   : > { %s3306_s14 = scalar_select %p2177_p0, 1, 0 }
  0x25   : > { %s2184_s17 = sshll.u32 %s2050_s25, 8  ;;  %s316_s18 = scalar_lea.vmem [#allocation5], %s1615_s16 }
  0x26   : > { %s325_s19 = sshll.u32 %s316_s18, 4  ;;  %s3307_s1 = sld [smem:[#allocation28_spill]]  ;;  %s2192_s19 = int_to_ptr.vmem [resolvable:$true] %s325_s19 }
  0x27   : > { %s2196_s7 = scalar_lea.sflag [#allocation6], %s3270_s15  ;;  %p2202_p2 = pneg %p2177_p0 }
  0x2c   : > { %s2190_s30 = scalar_lea.hbm %s3307_s1, %s2184_s17  ;;  %s1785_s28 = scalar_lea.hbm %s3307_s1, 512 }
  0x2d   : > { %s1780_s8 = scalar_lea.hbm %s2190_s30, 256  ;;  %p1786_p5 = scmp.lt.u32.totalorder %s2190_s30, %s3307_s1 }
  0x2e   : > { %p1781_p1 = scmp.ne.s32.totalorder %s2190_s30, %s1780_s8  ;;  %p1787_p6 = scmp.lt.u32.totalorder %s1785_s28, %s1780_s8 }
  0x2f   : > { %p1789_p10 = scmp.lt.u32.totalorder %s1780_s8, %s2190_s30 }
  0x30   : > { %p1783_p3 = pnand %p2202_p2, %p1781_p1  ;;  %p1788_p7 = por %p1787_p6, %p1786_p5 }
  0x32   : > { %p1784_p4 = pneg %p1783_p3  ;;  %p1790_p13 = por %p1789_p10, %p1788_p7 }
  0x34   : > { %p1791_p12 = pnand %p1790_p13, %p1784_p4 }
  0x36   : > { %1794 = shalt.err (!%p1791_p12)
}
  0x37   : > { %s1795_s15 = scalar_lea.vmem %s2192_s19, 256  ;;  %s2056_s18 = smov [#allocation5]  }
  0x38   : > { %p1796_p1 = scmp.ne.s32.totalorder %s2192_s19, %s1795_s15  ;;  %s1800_s20 = sshll.u32 %s2056_s18, 4  ;;  %s1801_s20 = int_to_ptr.vmem [resolvable:$false] %s1800_s20 }
  0x39   : > { %s1802_s29 = scalar_lea.vmem %s1801_s20, 512  ;;  %p1803_p9 = scmp.lt.s32.totalorder %s2192_s19, %s1801_s20 }
  0x3a   : > { %p1798_p3 = pnand %p1796_p1, %p2202_p2  ;;  %p1804_p8 = scmp.lt.s32.totalorder %s1802_s29, %s1795_s15 }
  0x3c   : > { %p1799_p11 = pneg %p1798_p3  ;;  %p1805_p5 = por %p1804_p8, %p1803_p9 }
  0x3e   : > { %p1806_p6 = pnand %p1805_p5, %p1799_p11 }
  0x40   : > { %1809 = shalt.err (!%p1806_p6)
}
  0x41   : > { %s3274_s11 = smov 128   ;;  %s3276_s8 = smov 8  }
  0x42   : > { %1670 = dma.hbm_to_vmem [thread:$0]  (!%p2177_p0), %s2190_s30, 256, %s2192_s19, %s2196_s7, %s3274_s11, %s3274_s11, %s3276_s8  }
  0x43   : > { %p1626_p8 = scmp.ge.s32.totalorder %s2054_s26, 1  ;;  %p433_p9 = scmp.lt.s32.totalorder %s2054_s26, 3 }
  0x44   : > { %s2232_s15 = smul.u32 768, %s2050_s25  ;;  %s3310_s3 = sld [smem:[#allocation29_spill]] }
  0x45   : > { %p2234_p11 = pnand %p1626_p8, %p433_p9  ;;  %s3281_s18 = smul.u32 24, %s2173_s13 }
  0x46   : > { %s1637_s20 = sadd.s32 128, %s2232_s15  ;;  %s3311_s11 = sand.u32 1, %s2054_s26  }
  0x47   : > { %s3309_s28 = scalar_select %p2234_p11, 1, 0 }
  0x48   : > { %s365_s19 = scalar_lea.vmem [#allocation8], %s3281_s18  ;;  %s2251_s8 = scalar_lea.sflag [#allocation9], %s3311_s11 }
  0x49   : > { %s377_s30 = sshll.u32 %s365_s19, 4  ;;  %s2247_s30 = int_to_ptr.vmem [resolvable:$true] %s377_s30 }
  0x4a   : > { %s2243_s23 = scalar_lea.hbm %s3310_s3, %s1637_s20  ;;  %s1815_s29 = scalar_lea.hbm %s3310_s3, 1536 }
  0x4b   : > { %s1810_s25 = scalar_lea.hbm %s2243_s23, 384  ;;  %p1816_p10 = scmp.lt.u32.totalorder %s2243_s23, %s3310_s3 }
  0x4c   : > { %p1811_p12 = scmp.ne.s32.totalorder %s2243_s23, %s1810_s25  ;;  %p1817_p13 = scmp.lt.u32.totalorder %s1815_s29, %s1810_s25 }
  0x4d   : > { %p1819_p3 = scmp.lt.u32.totalorder %s1810_s25, %s2243_s23 }
  0x4e   : > { %p1813_p4 = pnand %p1811_p12, %p2202_p2  ;;  %p1818_p1 = por %p1817_p13, %p1816_p10 }
  0x50   : > { %p1814_p7 = pneg %p1813_p4  ;;  %p1820_p5 = por %p1819_p3, %p1818_p1 }
  0x52   : > { %p1821_p6 = pnand %p1820_p5, %p1814_p7 }
  0x54   : > { %1824 = shalt.err (!%p1821_p6)
}
  0x55   : > { %s1825_s11 = scalar_lea.vmem %s2247_s30, 384  ;;  %s2059_s19 = smov [#allocation8]  }
  0x56   : > { %p1826_p8 = scmp.ne.s32.totalorder %s2247_s30, %s1825_s11  ;;  %s1830_s1 = sshll.u32 %s2059_s19, 4  ;;  %s1831_s1 = int_to_ptr.vmem [resolvable:$false] %s1830_s1 }
  0x57   : > { %s1832_s21 = scalar_lea.vmem %s1831_s1, 768  ;;  %p1833_p4 = scmp.lt.s32.totalorder %s2247_s30, %s1831_s1 }
  0x58   : > { %p1828_p9 = pnand %p1826_p8, %p2202_p2  ;;  %p1834_p11 = scmp.lt.s32.totalorder %s1832_s21, %s1825_s11 }
  0x5a   : > { %p1829_p12 = pneg %p1828_p9  ;;  %p1835_p10 = por %p1834_p11, %p1833_p4 }
  0x5c   : > { %p1836_p13 = pnand %p1835_p10, %p1829_p12 }
  0x5e   : > { %1839 = shalt.err (!%p1836_p13)
}
  0x5f   : > { %s3287_s25 = smov 256   ;;  %s3312_s12 = smov 8  }
  0x60   : > { %s3313_s20 = smov 128   ;;  %s1642_s29 = smul.u32 48, %s2173_s13 }
  0x61   : > { %1676 = dma.hbm_to_vmem [thread:$0]  (!%p2177_p0), %s2243_s23, 384, %s2247_s30, %s2251_s8, %s3287_s25, %s3313_s20, %s3312_s12  }
  0x62   : > { %s2283_s1 = scalar_lea.hbm %s3262_s0, %s2232_s15  ;;  %s2289_s3 = scalar_lea.hbm %s3264_s2, %s2232_s15 }
  0x63   : > { %s3314_s26 = smul.u32 24, %s2173_s13  ;;  %s293_s24 = scalar_lea.vmem [#allocation2], %s1642_s29 }
  0x64   : > { %s302_s23 = sshll.u32 %s293_s24, 4  ;;  %s1620_s30 = sshll.u32 %s2173_s13, 3  ;;  %s2295_s23 = int_to_ptr.vmem [resolvable:$true] %s302_s23 }
  0x65   : > { %s339_s6 = scalar_lea.vmem [#allocation7], %s3314_s26  ;;  %s290_s11 = scalar_lea.sflag [#allocation3], %s2173_s13 }
  0x66   : > { %s351_s10 = sshll.u32 %s339_s6, 4  ;;  %s1840_s19 = scalar_lea.hbm %s2283_s1, 768  ;;  %s2293_s10 = int_to_ptr.vmem [resolvable:$true] %s351_s10 }
  0x67   : > { %p1841_p11 = scmp.ne.s32.totalorder %s2283_s1, %s1840_s19  ;;  %s1845_s21 = scalar_lea.hbm %s3262_s0, 1536 }
  0x68   : > { %p1846_p3 = scmp.lt.u32.totalorder %s2283_s1, %s3262_s0  ;;  %p1847_p5 = scmp.lt.u32.totalorder %s1845_s21, %s1840_s19 }
  0x69   : > { %p1843_p7 = pnand %p1841_p11, %p2202_p2  ;;  %p1849_p8 = scmp.lt.u32.totalorder %s1840_s19, %s2283_s1 }
  0x6a   : > { %p1848_p6 = por %p1847_p5, %p1846_p3 }
  0x6b   : > { %p1844_p1 = pneg %p1843_p7 }
  0x6c   : > { %p1850_p9 = por %p1849_p8, %p1848_p6 }
  0x6e   : > { %p1851_p12 = pnand %p1850_p9, %p1844_p1 }
  0x70   : > { %1854 = shalt.err (!%p1851_p12)
}
  0x71   : > { %s1855_s6 = scalar_lea.vmem %s2295_s23, 768  ;;  %s2061_s24 = smov [#allocation2]  }
  0x72   : > { %p1856_p4 = scmp.ne.s32.totalorder %s2295_s23, %s1855_s6  ;;  %s1860_s29 = sshll.u32 %s2061_s24, 4  ;;  %s1861_s29 = int_to_ptr.vmem [resolvable:$false] %s1860_s29 }
  0x73   : > { %s1862_s25 = scalar_lea.vmem %s1861_s29, 1536  ;;  %p1863_p11 = scmp.lt.s32.totalorder %s2295_s23, %s1861_s29 }
  0x74   : > { %p1858_p10 = pnand %p1856_p4, %p2202_p2  ;;  %p1864_p7 = scmp.lt.s32.totalorder %s1862_s25, %s1855_s6 }
  0x76   : > { %p1859_p13 = pneg %p1858_p10  ;;  %p1865_p3 = por %p1864_p7, %p1863_p11 }
  0x78   : > { %p1866_p5 = pnand %p1865_p3, %p1859_p13 }
  0x7a   : > { %1869 = shalt.err (!%p1866_p5)
}
  0x7b   : > { %1667 = dma.hbm_to_vmem [thread:$0]  (!%p2177_p0), %s2283_s1, 768, %s2295_s23, %s290_s11, %s3313_s20, %s3313_s20, %s3312_s12  }
  0x7c   : > { %s1870_s19 = scalar_lea.hbm %s2289_s3, 384  ;;  %s1875_s21 = scalar_lea.hbm %s3264_s2, 1536 }
  0x7d   : > { %p1871_p1 = scmp.ne.s32.totalorder %s2289_s3, %s1870_s19  ;;  %p1876_p9 = scmp.lt.u32.totalorder %s2289_s3, %s3264_s2 }
  0x7e   : > { %p1877_p12 = scmp.lt.u32.totalorder %s1875_s21, %s1870_s19  ;;  %p1879_p10 = scmp.lt.u32.totalorder %s1870_s19, %s2289_s3 }
  0x7f   : > { %p1873_p6 = pnand %p1871_p1, %p2202_p2 }
  0x80   : > { %p1878_p4 = por %p1877_p12, %p1876_p9 }
  0x81   : > { %p1874_p8 = pneg %p1873_p6 }
  0x82   : > { %p1880_p13 = por %p1879_p10, %p1878_p4 }
  0x84   : > { %p1881_p11 = pnand %p1880_p13, %p1874_p8 }
  0x86   : > { %1884 = shalt.err (!%p1881_p11)
}
  0x87   : > { %s1885_s1 = scalar_lea.vmem %s2293_s10, 384  ;;  %s2062_s23 = smov [#allocation7]  }
  0x88   : > { %p1886_p7 = scmp.ne.s32.totalorder %s2293_s10, %s1885_s1  ;;  %s1890_s11 = sshll.u32 %s2062_s23, 4  ;;  %s1891_s11 = int_to_ptr.vmem [resolvable:$false] %s1890_s11 }
  0x89   : > { %s1892_s24 = scalar_lea.vmem %s1891_s11, 768  ;;  %p1893_p1 = scmp.lt.s32.totalorder %s2293_s10, %s1891_s11 }
  0x8a   : > { %p1888_p3 = pnand %p1886_p7, %p2202_p2  ;;  %p1894_p6 = scmp.lt.s32.totalorder %s1892_s24, %s1885_s1 }
  0x8c   : > { %p1889_p5 = pneg %p1888_p3  ;;  %p1895_p9 = por %p1894_p6, %p1893_p1 }
  0x8e   : > { %p1896_p12 = pnand %p1895_p9, %p1889_p5 }
  0x90   : > { %1899 = shalt.err (!%p1896_p12)
}
  0x91   : > { %s3315_s29 = smov 256   ;;  %s2354_s18 = scalar_lea.hbm %s3266_s4, %s2184_s17 }
  0x92   : > { %1673 = dma.hbm_to_vmem [thread:$0]  (!%p2177_p0), %s2289_s3, 384, %s2293_s10, %s2196_s7, %s3315_s29, %s3313_s20, %s3312_s12  }
  0x93   : > { %s391_s15 = scalar_lea.vmem [#allocation10], %s1620_s30  ;;  %s1900_s26 = scalar_lea.hbm %s2354_s18, 128 }
  0x94   : > { %s404_s21 = sshll.u32 %s391_s15, 4  ;;  %p1901_p8 = scmp.ne.s32.totalorder %s2354_s18, %s1900_s26  ;;  %s405_s21 = int_to_ptr.vmem [resolvable:$true] %s404_s21 }
  0x95   : > { %s1905_s10 = scalar_lea.hbm %s3266_s4, 512  ;;  %p1906_p13 = scmp.lt.u32.totalorder %s2354_s18, %s3266_s4 }
  0x96   : > { %p1903_p4 = pnand %p1901_p8, %p2202_p2  ;;  %p1907_p11 = scmp.lt.u32.totalorder %s1905_s10, %s1900_s26 }
  0x97   : > { %p1909_p3 = scmp.lt.u32.totalorder %s1900_s26, %s2354_s18 }
  0x98   : > { %p1904_p10 = pneg %p1903_p4  ;;  %p1908_p7 = por %p1907_p11, %p1906_p13 }
  0x9a   : > { %p1910_p5 = por %p1909_p3, %p1908_p7 }
  0x9c   : > { %p1911_p1 = pnand %p1910_p5, %p1904_p10 }
  0x9e   : > { %1914 = shalt.err (!%p1911_p1)
}
  0x9f   : > { %s1915_s20 = scalar_lea.vmem %s405_s21, 128  ;;  %s2063_s1 = smov [#allocation10]  }
  0xa0   : > { %p1916_p6 = scmp.ne.s32.totalorder %s405_s21, %s1915_s20  ;;  %s1920_s23 = sshll.u32 %s2063_s1, 4  ;;  %s1921_s23 = int_to_ptr.vmem [resolvable:$false] %s1920_s23 }
  0xa1   : > { %s1922_s11 = scalar_lea.vmem %s1921_s23, 256  ;;  %p1923_p8 = scmp.lt.s32.totalorder %s405_s21, %s1921_s23 }
  0xa2   : > { %p1918_p9 = pnand %p1916_p6, %p2202_p2  ;;  %p1924_p4 = scmp.lt.s32.totalorder %s1922_s11, %s1915_s20 }
  0xa4   : > { %p1919_p12 = pneg %p1918_p9  ;;  %p1925_p0 = por %p1924_p4, %p1923_p8 }
  0xa6   : > { %p1926_p11 = pnand %p1925_p0, %p1919_p12 }
  0xa8   : > { %1929 = shalt.err (!%p1926_p11)
}
  0xa9   : > { %p3316_p13 = scmp.ne.s32.totalorder %s3306_s14, 0  ;;  %s1640_s24 = sadd.s32 128, %s2184_s17 }
  0xaa   : > { %s415_s29 = scalar_lea.vmem [#allocation11], %s1620_s30  ;;  %s2382_s26 = scalar_lea.hbm %s3267_s5, %s1640_s24 }
  0xab   : > { %1679 = dma.hbm_to_vmem [thread:$0]  (!%p3316_p13), %s2354_s18, 128, %s405_s21, %s2251_s8  }
  0xac   : > { %s428_s25 = sshll.u32 %s415_s29, 4  ;;  %s412_s6 = scalar_lea.sflag [#allocation12], %s2173_s13  ;;  %s429_s25 = int_to_ptr.vmem [resolvable:$true] %s428_s25 }
  0xad   : > { %s1930_s3 = scalar_lea.hbm %s2382_s26, 128  ;;  %s1935_s30 = scalar_lea.hbm %s3267_s5, 512 }
  0xae   : > { %p1931_p0 = scmp.ne.s32.totalorder %s2382_s26, %s1930_s3  ;;  %p1936_p3 = scmp.lt.u32.totalorder %s2382_s26, %s3267_s5 }
  0xaf   : > { %p1937_p5 = scmp.lt.u32.totalorder %s1935_s30, %s1930_s3  ;;  %p1939_p6 = scmp.lt.u32.totalorder %s1930_s3, %s2382_s26 }
  0xb0   : > { %p1933_p10 = pnand %p1931_p0, %p2202_p2 }
  0xb1   : > { %p1938_p1 = por %p1937_p5, %p1936_p3 }
  0xb2   : > { %p1934_p7 = pneg %p1933_p10 }
  0xb3   : > { %p1940_p9 = por %p1939_p6, %p1938_p1 }
  0xb5   : > { %p1941_p12 = pnand %p1940_p9, %p1934_p7 }
  0xb7   : > { %1944 = shalt.err (!%p1941_p12)
}
  0xb8   : > { %s1945_s13 = scalar_lea.vmem %s429_s25, 128  ;;  %s2064_s10 = smov [#allocation11]  }
  0xb9   : > { %p1946_p8 = scmp.ne.s32.totalorder %s429_s25, %s1945_s13  ;;  %s1950_s7 = sshll.u32 %s2064_s10, 4  ;;  %s1951_s7 = int_to_ptr.vmem [resolvable:$false] %s1950_s7 }
  0xba   : > { %s1952_s12 = scalar_lea.vmem %s1951_s7, 256  ;;  %p1953_p0 = scmp.lt.s32.totalorder %s429_s25, %s1951_s7 }
  0xbb   : > { %p1948_p4 = pnand %p1946_p8, %p2202_p2  ;;  %p1954_p10 = scmp.lt.s32.totalorder %s1952_s12, %s1945_s13 }
  0xbd   : > { %p1949_p11 = pneg %p1948_p4  ;;  %p1955_p13 = por %p1954_p10, %p1953_p0 }
  0xbf   : > { %p1956_p3 = pnand %p1955_p13, %p1949_p11 }
  0xc1   : > { %1959 = shalt.err (!%p1956_p3)
}
  0xc2   : > { %p3317_p5 = scmp.ne.s32.totalorder %s3306_s14, 0  ;;  %p3318_p7 = scmp.ne.s32.totalorder %s3309_s28, 0 }
  0xc3   : > { %s2405_s16 = sand.u32 (!%p3318_p7), 1, %s2038_s22   ;;  %p3319_p2 = scmp.ne.s32.totalorder (!%p3318_p7), %s3300_s9, 0 }
  0xc4   : > { %1682 = dma.hbm_to_vmem [thread:$0]  (!%p3317_p5), %s2382_s26, 128, %s429_s25, %s412_s6  }
  0xc5   : > { %437 = sbr.rel (%p3318_p7) target bundleno = 683 (0x2ab), region = 44  ;;  %s440_s1 = scalar_lea.sflag (!%p3318_p7), [#allocation3], %s2405_s16 }
  0xc6   : > { %s1648_s20 = smul.u32 (!%p3318_p7), 48, %s2405_s16 }
  0xc8   : > { %s2409_s23 = scalar_lea.vmem (!%p3318_p7), [#allocation2], %s1648_s20 }
  0xcc   : > { %2013 = dma.done.wait (%p3319_p2), %s440_s1, 768  }
  0xcd   : > { %2015 = vsyncadd (%p3319_p2), %s440_s1, 4294966528  ;;  %s448_s14 = sand.u32 1, %s2135_s27   ;;  %s1627_s28 = sshll.u32 %s2405_s16, 4 }
  0xce   : > { %s449_s11 = scalar_lea.sflag [#allocation6], %s448_s14  ;;  %s2417_s24 = scalar_lea.vmem [#allocation5], %s1627_s28 }
  0xcf   : > { %2017 = dma.done.wait (%p3319_p2), %s449_s11, 640  }
  0xd0   : > { %2019 = vsyncadd (%p3319_p2), %s449_s11, 4294966656  ;;  %s1649_s29 = smul.u32 24, %s2405_s16  ;;  %s467_s19 = scalar_lea.sflag [#allocation9], %s448_s14 }
  0xd2   : > { %s461_s25 = scalar_lea.vmem [#allocation7], %s1649_s29  ;;  %s2424_s15 = scalar_lea.vmem [#allocation8], %s1649_s29 }
  0xd3   : > { %2021 = dma.done.wait (%p3319_p2), %s467_s19, 512  }
  0xd4   : > { %2023 = vsyncadd (%p3319_p2), %s467_s19, 4294966784  ;;  %s2431_s27 = sshll.u32 %s2405_s16, 3  ;;  %s485_s6 = scalar_lea.sflag [#allocation12], %s2405_s16 }
  0xd5   : > { %s479_s26 = scalar_lea.vmem [#allocation10], %s2431_s27  ;;  %s488_s3 = scalar_lea.vmem [#allocation11], %s2431_s27 }
  0xd6   : > { %2025 = dma.done.wait (%p3319_p2), %s485_s6, 128  }
  0xd7   : > { %2027 = vsyncadd (%p3319_p2), %s485_s6, 4294967168  ;;  %v2441_v0 = vld [vmem:[%s2409_s23] sm:$0xff]  ;;  %v2444_v1 = vld [vmem:[%s2409_s23 + $0x10] sm:$0xff]  ;;  %s2065_s17 = smov 16   ;;  %vm607_vm0 = vcmask 1047680   ;;  %s2066_s9 = smov 127  }
  0xd8   : > { %608 = vrot.lane.b32.xlu0 %v2441_v0, %s2065_s17  ;;  %614 = vrot.lane.b32.xlu1 %v2444_v1, %s2065_s17  ;;  %v2451_v2 = vld [vmem:[%s2409_s23 + $0x8] sm:$0xff]  ;;  %v2454_v3 = vld [vmem:[%s2409_s23 + $0x18] sm:$0xff]  ;;  %s2067_s8 = smov 113   ;;  %vm891_vm5 = vcmask 130048   ;;  %s3320_s30 = sld [smem:[#allocation21_spill]] }
  0xd9   : > { %v2460_v4 = vld [vmem:[%s461_s25 + $0x1] sm:$0x1]  ;;  %v2462_v5 = vld [vmem:[%s461_s25 + $0x9] sm:$0x1]  ;;  %v2478_v8 = vld [vmem:[%s461_s25 + $0x11] sm:$0x1] }
  0xda   : > { %v2469_v6 = vld [vmem:[%s2409_s23 + $0x20] sm:$0xff]  ;;  %v2472_v7 = vld [vmem:[%s2409_s23 + $0x28] sm:$0xff]  ;;  %v2481_v9 = vld [vmem:[%s2424_s15 + $0x6] sm:$0x1]  ;;  %s3321_s18 = sld [smem:[#allocation25_spill]]  ;;  %s541_s13 = scalar_lea.vmem [#allocation13], %s2431_s27 }
  0xdb   : > { %v2488_v10 = vld [vmem:[%s2424_s15 + $0xe] sm:$0x1]  ;;  %v2491_v11 = vld [vmem:[%s2424_s15 + $0x16] sm:$0x1]  ;;  %v2509_v14 = vld [vmem:[%s479_s26 + $0x1] sm:$0x1] }
  0xdc   : > { %611 = vrot.lane.b32.xlu0 %v2451_v2, %s2065_s17  ;;  %617 = vrot.lane.b32.xlu1 %v2454_v3, %s2065_s17  ;;  %v2498_v12 = vld [vmem:[%s2417_s24] sm:$0xff]  ;;  %v2501_v13 = vld [vmem:[%s2417_s24 + $0x8] sm:$0xff]  ;;  %s1408_s10 = sshll.u32 %s541_s13, 4  ;;  %s3322_s20 = sld [smem:[#allocation30_spill]]  ;;  %s3214_s10 = int_to_ptr.vmem [resolvable:$true] %s1408_s10 }
  0xdd   : > { %v2513_v15 = vld [vmem:[%s488_s3 + $0x6] sm:$0x1]  ;;  %s1960_s14 = scalar_lea.vmem %s3214_s10, 128  ;;  %s2068_s28 = smov [#allocation13]  }
  0xde   : > { %s1632_s21 = sshll.u32 %s3320_s30, 7  ;;  %p1961_p13 = scmp.ne.s32.totalorder %s3214_s10, %s1960_s14 }
  0xdf   : > { %s1964_s11 = sshll.u32 %s2068_s28, 4  ;;  %s1965_s11 = int_to_ptr.vmem [resolvable:$false] %s1964_s11 }
  0xe0   : > { %722 = vrot.lane.b32.xlu0 %v2460_v4, %s2065_s17  ;;  %725 = vrot.lane.b32.xlu1 %v2462_v5, %s2065_s17  ;;  %p3323_p1 = scmp.ne.s32.totalorder %s3321_s18, 0  ;;  %p1967_p12 = scmp.lt.s32.totalorder %s3214_s10, %s1965_s11 }
  0xe2   : > { %s3212_s1 = scalar_lea.hbm %s3322_s20, %s1632_s21  ;;  %p1962_p6 = pnand %p1961_p13, %p3323_p1 }
  0xe4   : > { %620 = vrot.lane.b32.xlu0 %v2469_v6, %s2065_s17  ;;  %623 = vrot.lane.b32.xlu1 %v2472_v7, %s2065_s17  ;;  %p1963_p9 = pneg %p1962_p6 }
  0xe8   : > { %728 = vrot.lane.b32.xlu0 %v2478_v8, %s2065_s17  ;;  %764 = vrot.lane.b32.xlu1 %v2481_v9, %s2065_s17 }
  0xec   : > { %767 = vrot.lane.b32.xlu0 %v2488_v10, %s2065_s17  ;;  %770 = vrot.lane.b32.xlu1 %v2491_v11, %s2065_s17 }
  0xf0   : > { %694 = vrot.lane.b32.xlu0 %v2498_v12, %s2065_s17  ;;  %697 = vrot.lane.b32.xlu1 %v2501_v13, %s2065_s17 }
  0xf4   : > { %806 = vrot.lane.b32.xlu0 %v2509_v14, %s2065_s17  ;;  %820 = vrot.lane.b32.xlu1 %v2513_v15, %s2065_s17 }
 0x14a   : > { %v609_v16 = vpop.permute.xlu0 %608  ;;  %v615_v17 = vpop.permute.xlu1 %614 }
 0x14b   : > { %v610_v18 = vsel %vm607_vm0, %v609_v16, %v2441_v0  ;;  %v616_v19 = vsel %vm607_vm0, %v615_v17, %v2444_v1 }
 0x14c   : > { %626 = vrot.lane.b32.xlu0 %v610_v18, %s2065_s17 }
 0x14e   : > { %v612_v20 = vpop.permute.xlu0 %611  ;;  %v618_v21 = vpop.permute.xlu1 %617 }
 0x14f   : > { %v613_v22 = vsel %vm607_vm0, %v612_v20, %v2451_v2  ;;  %v619_v23 = vsel %vm607_vm0, %v618_v21, %v2454_v3 }
 0x150   : > { %630 = vrot.lane.b32.xlu0 %v616_v19, %s2065_s17  ;;  %628 = vrot.lane.b32.xlu1 %v613_v22, %s2065_s17 }
 0x152   : > { %v723_v24 = vpop.permute.xlu0 %722  ;;  %v726_v25 = vpop.permute.xlu1 %725 }
 0x153   : > { %v724_v26 = vsel %vm607_vm0, %v723_v24, %v2460_v4  ;;  %v727_v27 = vsel %vm607_vm0, %v726_v25, %v2462_v5 }
 0x154   : > { %632 = vrot.lane.b32.xlu1 %v619_v23, %s2065_s17  ;;  %731 = vrot.lane.b32.xlu0 %v724_v26, %s2065_s17 }
 0x156   : > { %v621_v28 = vpop.permute.xlu0 %620  ;;  %v624_v29 = vpop.permute.xlu1 %623 }
 0x157   : > { %v622_v30 = vsel %vm607_vm0, %v621_v28, %v2469_v6  ;;  %v625_v31 = vsel %vm607_vm0, %v624_v29, %v2472_v7 }
 0x158   : > { %733 = vrot.lane.b32.xlu1 %v727_v27, %s2065_s17  ;;  %634 = vrot.lane.b32.xlu0 %v622_v30, %s2065_s17 }
 0x15a   : > { %v729_v32 = vpop.permute.xlu0 %728  ;;  %v765_v33 = vpop.permute.xlu1 %764 }
 0x15b   : > { %v730_v34 = vsel %vm607_vm0, %v729_v32, %v2478_v8  ;;  %v766_v35 = vsel %vm607_vm0, %v765_v33, %v2481_v9  ;;  %v596_v32 = vlaneseq }
 0x15c   : > { %636 = vrot.lane.b32.xlu1 %v625_v31, %s2065_s17  ;;  %735 = vrot.lane.b32.xlu0 %v730_v34, %s2065_s17  ;;  %v1036_v34 = vrot.slane %v2451_v2, 7 }
 0x15d   : > { %v2632_v33 = vshrl.u32 %v596_v32, 7 }
 0x15e   : > { %v768_v36 = vpop.permute.xlu0 %767  ;;  %v771_v37 = vpop.permute.xlu1 %770 }
 0x15f   : > { %v769_v38 = vsel %vm607_vm0, %v768_v36, %v2488_v10  ;;  %v772_v39 = vsel %vm607_vm0, %v771_v37, %v2491_v11  ;;  %v2637_v36 = vsub.s32 0, %v2632_v33  ;;  %v1037_v37 = vrot.slane %v2454_v3, 7 }
 0x160   : > { %773 = vrot.lane.b32.xlu1 %v766_v35, %s2065_s17  ;;  %775 = vrot.lane.b32.xlu0 %v769_v38, %s2065_s17  ;;  %v1033_v35 = vrot.slane %v2441_v0, 7  ;;  %v1034_v38 = vrot.slane %v2444_v1, 7  ;;  %vm840_vm1 = vcmp.lt.s32.totalorder %v2632_v33, 1  ;;  %vm601_vm2 = vcmp.eq.s32.totalorder %v2632_v33, 0 }
 0x161   : > { %vm958_vm3 = vcmp.lt.s32.totalorder %v2632_v33, 7 }
 0x162   : > { %v695_v40 = vpop.permute.xlu0 %694  ;;  %v698_v41 = vpop.permute.xlu1 %697 }
 0x163   : > { %v696_v42 = vsel %vm607_vm0, %v695_v40, %v2498_v12  ;;  %v699_v43 = vsel %vm607_vm0, %v698_v41, %v2501_v13  ;;  %v1042_v40 = vsel %vm840_vm1, %v1036_v34, %v1033_v35  ;;  %v1052_v41 = vrot.slane %v2462_v5, %v2637_v36 }
 0x164   : > { %777 = vrot.lane.b32.xlu1 %v772_v39, %s2065_s17  ;;  %700 = vrot.lane.b32.xlu0 %v696_v42, %s2065_s17  ;;  %v1048_v39 = vrot.slane %v2460_v4, %v2637_v36  ;;  %v1043_v42 = vsel %vm840_vm1, %v1037_v37, %v1034_v38 }
 0x166   : > { %v807_v44 = vpop.permute.xlu0 %806  ;;  %v821_v45 = vpop.permute.xlu1 %820 }
 0x167   : > { %v808_v46 = vsel %vm607_vm0, %v807_v44, %v2509_v14  ;;  %v822_v47 = vsel %vm607_vm0, %v821_v45, %v2513_v15  ;;  %v2653_v44 = vadd.s32 8, %v2632_v33  ;;  %v1109_v45 = vrot.slane %v2441_v0, 1 }
 0x168   : > { %702 = vrot.lane.b32.xlu1 %v699_v43, %s2065_s17  ;;  %809 = vrot.lane.b32.xlu0 %v808_v46, %s2065_s17  ;;  %v1035_v43 = vrot.slane %v2469_v6, 7  ;;  %v1112_v46 = vrot.slane %v2451_v2, 1 }
 0x169   : > { %vm604_vm4 = vcmp.eq.s32.totalorder %v2653_v44, 15 }
 0x16c   : > { %823 = vrot.lane.b32.xlu1 %v822_v47, %s2065_s17  ;;  %v1110_v47 = vrot.slane %v2444_v1, 1 }
 0x1be   : > { %v627_v48 = vpop.permute.xlu0 %626 }
 0x1bf   : > { %v638_v49 = vsel %vm607_vm0, %v627_v48, %v2441_v0  ;;  %v1113_v48 = vrot.slane %v2454_v3, 1 }
 0x1c0   : > { %652 = vrot.lane.b32.xlu0 %v638_v49, %s2066_s9 }
 0x1c2   : > { %v629_v50 = vpop.permute.xlu1 %628  ;;  %v631_v51 = vpop.permute.xlu0 %630 }
 0x1c3   : > { %v639_v52 = vsel %vm607_vm0, %v629_v50, %v2451_v2  ;;  %v640_v53 = vsel %vm607_vm0, %v631_v51, %v2444_v1  ;;  %v1128_v50 = vrot.slane %v2488_v10, %v2637_v36  ;;  %v1059_v51 = vsel %vm601_vm2, %v1052_v41, %v1043_v42 }
 0x1c4   : > { %654 = vrot.lane.b32.xlu1 %v639_v52, %s2066_s9  ;;  %656 = vrot.lane.b32.xlu0 %v640_v53, %s2066_s9 }
 0x1c6   : > { %v633_v54 = vpop.permute.xlu1 %632  ;;  %v732_v56 = vpop.permute.xlu0 %731 }
 0x1c7   : > { %v641_v55 = vsel %vm607_vm0, %v633_v54, %v2454_v3  ;;  %v737_v57 = vsel %vm607_vm0, %v732_v56, %v2460_v4  ;;  %v1038_v4 = vrot.slane %v2472_v7, 7  ;;  %v1056_v54 = vrot.slane %v2478_v8, %v2637_v36 }
 0x1c8   : > { %658 = vrot.lane.b32.xlu1 %v641_v55, %s2066_s9  ;;  %670 = vrot.lane.b32.xlu0 %v638_v49, %s2067_s8  ;;  %v1124_v49 = vrot.slane %v2481_v9, %v2637_v36  ;;  %v1114_v56 = vrot.slane %v2472_v7, 1 }
 0x1ca   : > { %v734_v58 = vpop.permute.xlu1 %733  ;;  %v635_v60 = vpop.permute.xlu0 %634 }
 0x1cb   : > { %v738_v59 = vsel %vm607_vm0, %v734_v58, %v2462_v5  ;;  %v642_v61 = vsel %vm607_vm0, %v635_v60, %v2469_v6  ;;  %v1057_v5 = vsel %vm601_vm2, %v1048_v39, %v1042_v40 }
 0x1cc   : > { %672 = vrot.lane.b32.xlu1 %v639_v52, %s2067_s8  ;;  %674 = vrot.lane.b32.xlu0 %v640_v53, %s2067_s8  ;;  %v1118_v52 = vsel %vm958_vm3, %v1112_v46, %v1109_v45  ;;  %v1119_v53 = vsel %vm958_vm3, %v1113_v48, %v1110_v47 }
 0x1cd   : > { %v1134_v58 = vsel %vm604_vm4, %v1124_v49, %v1118_v52 }
 0x1ce   : > { %v637_v62 = vpop.permute.xlu1 %636  ;;  %v736_v16 = vpop.permute.xlu0 %735 }
 0x1cf   : > { %v643_v63 = vsel %vm607_vm0, %v637_v62, %v2472_v7  ;;  %v739_v17 = vsel %vm607_vm0, %v736_v16, %v2478_v8  ;;  %v1132_v8 = vrot.slane %v2491_v11, %v2637_v36  ;;  %v1115_v62 = vsel %vm958_vm3, %v1109_v45, %v1112_v46 }
 0x1d0   : > { %676 = vrot.lane.b32.xlu1 %v641_v55, %s2067_s8  ;;  %743 = vrot.lane.b32.xlu0 %v737_v57, %s2066_s9  ;;  %v1073_v55 = vsub.f32 %v2441_v0, %v1057_v5  ;;  %v1039_v16 = vsel %vm840_vm1, %v1033_v35, %v1036_v34  ;;  %v1041_v35 = vsel %vm840_vm1, %v1035_v43, %v1038_v4 }
 0x1d1   : > { %v1078_v45 = vsub.f32 %v2472_v7, %v1041_v35 }
 0x1d2   : > { %v774_v18 = vpop.permute.xlu1 %773  ;;  %v776_v20 = vpop.permute.xlu0 %775 }
 0x1d3   : > { %v779_v19 = vsel %vm607_vm0, %v774_v18, %v2481_v9  ;;  %v780_v21 = vsel %vm607_vm0, %v776_v20, %v2488_v10  ;;  %v1044_v9 = vsel %vm840_vm1, %v1038_v4, %v1035_v43  ;;  %v1111_v10 = vrot.slane %v2469_v6, 1 }
 0x1d4   : > { %745 = vrot.lane.b32.xlu1 %v738_v59, %s2066_s9  ;;  %752 = vrot.lane.b32.xlu0 %v737_v57, %s2067_s8  ;;  %v1075_v57 = vsub.f32 %v2444_v1, %v1059_v51 }
 0x1d5   : > { %v1120_v60 = vsel %vm958_vm3, %v1114_v56, %v1111_v10 }
 0x1d6   : > { %v778_v22 = vpop.permute.xlu1 %777  ;;  %v701_v24 = vpop.permute.xlu0 %700  ;;  %v1081_v20 = vmul.f32 %v1075_v57, %v1075_v57 }
 0x1d7   : > { %v781_v23 = vsel %vm607_vm0, %v778_v22, %v2491_v11  ;;  %v704_v25 = vsel %vm607_vm0, %v701_v24, %v2498_v12  ;;  %v1150_v11 = vsub.f32 %v2451_v2, %v1134_v58 }
 0x1d8   : > { %754 = vrot.lane.b32.xlu1 %v738_v59, %s2067_s8  ;;  %660 = vrot.lane.b32.xlu0 %v642_v61, %s2066_s9  ;;  %v1136_v59 = vsel %vm604_vm4, %v1128_v50, %v1119_v53  ;;  %v1086_v34 = vsel %vm891_vm5, %v1081_v20, 0.0 }
 0x1d9   : > { %v1152_v18 = vsub.f32 %v2454_v3, %v1136_v59  ;;  %v2729_v59 = vand.u32 127, %v596_v32 }
 0x1da   : > { %v703_v26 = vpop.permute.xlu1 %702  ;;  %v810_v28 = vpop.permute.xlu0 %809 }
 0x1db   : > { %v705_v27 = vsel %vm607_vm0, %v703_v26, %v2501_v13  ;;  %v811_v29 = vsel %vm607_vm0, %v810_v28, %v2509_v14  ;;  %v1156_v28 = vmul.f32 %v1150_v11, %v1150_v11  ;;  %vm605_vm6 = vcmp.eq.s32.totalorder %v2729_v59, 0 }
 0x1dc   : > { %662 = vrot.lane.b32.xlu1 %v643_v63, %s2066_s9  ;;  %678 = vrot.lane.b32.xlu0 %v642_v61, %s2067_s8  ;;  %v1061_v61 = vsel %vm601_vm2, %v1056_v54, %v1044_v9  ;;  %vm606_vm7 = vcmp.eq.s32.totalorder %v2729_v59, 15 }
 0x1dd   : > { %v1077_v22 = vsub.f32 %v2469_v6, %v1061_v61  ;;  %v1166_v46 = vsel %vm891_vm5, %v1156_v28, 0.0  ;;  %v1140_v61 = vrot.slane %v2501_v13, 1 }
 0x1de   : > { %v824_v30 = vpop.permute.xlu1 %823 }
 0x1df   : > { %v825_v31 = vsel %vm607_vm0, %v824_v30, %v2513_v15 }
 0x1e0   : > { %680 = vrot.lane.b32.xlu1 %v643_v63, %s2067_s8  ;;  %747 = vrot.lane.b32.xlu0 %v739_v17, %s2066_s9  ;;  %v1116_v63 = vsel %vm958_vm3, %v1110_v47, %v1113_v48 }
 0x1e1   : > { %v1151_v24 = vsub.f32 %v2444_v1, %v1116_v63 }
 0x1e3   : > { %v1157_v39 = vmul.f32 %v1151_v24, %v1151_v24 }
 0x1e4   : > { %756 = vrot.lane.b32.xlu1 %v739_v17, %s2067_s8  ;;  %785 = vrot.lane.b32.xlu0 %v779_v19, %s2066_s9  ;;  %v1040_v17 = vsel %vm840_vm1, %v1034_v38, %v1037_v37  ;;  %v1083_v37 = vmul.f32 %v1077_v22, %v1077_v22 }
 0x1e5   : > { %v1076_v26 = vsub.f32 %v2454_v3, %v1040_v17  ;;  %v1162_v43 = vsel %vm891_vm5, %v1157_v39, 0.0  ;;  %v1146_v17 = vrot.slane %v2513_v15, %v2637_v36 }
 0x1e6   : > { %v1088_v49 = vsel %vm891_vm5, %v1083_v37, 0.0 }
 0x1e7   : > { %v1082_v42 = vmul.f32 %v1076_v26, %v1076_v26 }
 0x1e8   : > { %794 = vrot.lane.b32.xlu0 %v779_v19, %s2067_s8  ;;  %787 = vrot.lane.b32.xlu1 %v780_v21, %s2066_s9  ;;  %v1079_v19 = vmul.f32 %v1073_v55, %v1073_v55  ;;  %v1084_v55 = vmul.f32 %v1078_v45, %v1078_v45 }
 0x1e9   : > { %v1091_v52 = vsel %vm891_vm5, %v1082_v42, 0.0 }
 0x1ea   : > { %v1093_v32 = vsel %vm891_vm5, %v1084_v55, 0.0 }
 0x1ec   : > { %789 = vrot.lane.b32.xlu0 %v781_v23, %s2066_s9  ;;  %796 = vrot.lane.b32.xlu1 %v780_v21, %s2067_s8  ;;  %v1138_v21 = vsel %vm604_vm4, %v1132_v8, %v1120_v60  ;;  %v1139_v60 = vrot.slane %v2498_v12, 1 }
 0x1ed   : > { %v1154_v30 = vsub.f32 %v2472_v7, %v1138_v21 }
 0x1ee   : > { %v1142_v20 = vsel %vm958_vm3, %v1140_v61, %v1139_v60 }
 0x1ef   : > { %v1160_v48 = vmul.f32 %v1154_v30, %v1154_v30  ;;  %v1148_v24 = vsel %vm604_vm4, %v1146_v17, %v1142_v20 }
 0x1f0   : > { %798 = vrot.lane.b32.xlu1 %v781_v23, %s2067_s8  ;;  %708 = vrot.lane.b32.xlu0 %v704_v25, %s2066_s9  ;;  %v1149_v23 = vsub.f32 %v2441_v0, %v1115_v62 }
 0x1f1   : > { %v1169_v9 = vsel %vm891_vm5, %v1160_v48, 0.0 }
 0x1f2   : > { %v1155_v38 = vmul.f32 %v1149_v23, %v1149_v23 }
 0x1f4   : > { %710 = vrot.lane.b32.xlu1 %v705_v27, %s2066_s9  ;;  %714 = vrot.lane.b32.xlu0 %v704_v25, %s2067_s8  ;;  %v1074_v25 = vsub.f32 %v2451_v2, %v1039_v16  ;;  %v1161_v50 = vsel %vm891_vm5, %v1155_v38, 0.0  ;;  %v1070_v16 = vrot.slane %v2509_v14, %v2637_v36 }
 0x1f5   : > { %v1163_v58 = vadd.f32 %v1162_v43, %v1161_v50 }
 0x1f6   : > { %v1080_v41 = vmul.f32 %v1074_v25, %v1074_v25 }
 0x1f8   : > { %716 = vrot.lane.b32.xlu1 %v705_v27, %s2067_s8  ;;  %813 = vrot.lane.b32.xlu0 %v811_v29, %s2066_s9  ;;  %v1117_v27 = vsel %vm958_vm3, %v1111_v10, %v1114_v56  ;;  %v1090_v51 = vsel %vm891_vm5, %v1080_v41, 0.0  ;;  %v1063_v10 = vrot.slane %v2498_v12, 7  ;;  %v1064_v56 = vrot.slane %v2501_v13, 7 }
 0x1f9   : > { %v1153_v40 = vsub.f32 %v2469_v6, %v1117_v27  ;;  %v1092_v62 = vadd.f32 %v1091_v52, %v1090_v51 }
 0x1fb   : > { %v1159_v4 = vmul.f32 %v1153_v40, %v1153_v40  ;;  %v1094_v23 = vadd.f32 %v1093_v32, %v1092_v62 }
 0x1fc   : > { %816 = vrot.lane.b32.xlu1 %v811_v29, %s2067_s8  ;;  %827 = vrot.lane.b32.xlu0 %v825_v31, %s2066_s9  ;;  %v1158_v29 = vmul.f32 %v1152_v18, %v1152_v18 }
 0x1fd   : > { %v1164_v8 = vsel %vm891_vm5, %v1159_v4, 0.0  ;;  %v1065_v4 = vsel %vm840_vm1, %v1063_v10, %v1064_v56 }
 0x1fe   : > { %v1167_v47 = vsel %vm891_vm5, %v1158_v29, 0.0  ;;  %v1165_v22 = vadd.f32 %v1164_v8, %v1163_v58 }
 0x1ff   : > { %v1168_v53 = vadd.f32 %v1167_v47, %v1166_v46 }
 0x200   : > { %830 = vrot.lane.b32.xlu1 %v825_v31, %s2067_s8  ;;  %v1085_v31 = vsel %vm891_vm5, %v1079_v19, 0.0  ;;  %v1066_v19 = vsel %vm840_vm1, %v1064_v56, %v1063_v10  ;;  %v1173_v28 = vmul.f32 -1.0, %v1165_v22 }
 0x201   : > { %v1087_v5 = vadd.f32 %v1086_v34, %v1085_v31  ;;  %v1170_v63 = vadd.f32 %v1169_v9, %v1168_v53  ;;  %v1071_v15 = vsel %vm601_vm2, %v1070_v16, %v1066_v19  ;;  %v1172_v31 = vsub.f32 %v2501_v13, %v1148_v24 }
 0x202   : > { %v1095_v30 = vsub.f32 %v2498_v12, %v1071_v15  ;;  %v1098_v34 = vmul.f32 -1.0, %v1094_v23  ;;  %v1175_v45 = vmul.f32 1.442695, %v1173_v28 }
 0x203   : > { %v1089_v57 = vadd.f32 %v1088_v49, %v1087_v5  ;;  %v1174_v14 = vmul.f32 -1.0, %v1170_v63  ;;  %v2770_v47 = vmul.f32 %v1172_v31, %v1172_v31  ;;  %v1141_v5 = vsel %vm958_vm3, %v1139_v60, %v1140_v61 }
 0x204   : > { %v2768_v46 = vmul.f32 %v1095_v30, %v1095_v30  ;;  %v1101_v51 = vmul.f32 1.442695, %v1098_v34  ;;  %v2784_v58 = vsub.f32 %v2498_v12, %v1141_v5  ;;  %v2798_v12 = vsub.f32 %v2501_v13, %v1065_v4 }
 0x205   : > { %v1097_v21 = vmul.f32 -1.0, %v1089_v57  ;;  %v1177_v35 = vmul.f32 1.442695, %v1174_v14 }
 0x207   : > { %v1099_v27 = vmul.f32 1.442695, %v1097_v21 }
 0x209   : > { %1744 = vpow2.f32 %v1099_v27 }
 0x20a   : > { %1746 = vpow2.f32 %v1177_v35 }
 0x20b   : > { %1748 = vpow2.f32 %v1175_v45 }
 0x20c   : > { %1750 = vpow2.f32 %v1101_v51 }
 0x232   : > { %v653_v54 = vpop.permute.xlu0 %652 }
 0x236   : > { %v655_v11 = vpop.permute.xlu1 %654  ;;  %v2738_v18 = vpop.permute.xlu0 %656 }
 0x23a   : > { %v2750_v25 = vpop.permute.xlu1 %658  ;;  %v671_v26 = vpop.permute.xlu0 %670 }
 0x23b   : > { %v688_v29 = vsel %vm605_vm6, %v653_v54, %v671_v26  ;;  %v2759_v37 = vsel %vm606_vm7, %v671_v26, %v653_v54  ;;  %v2827_v26 = vpop.eup %1744 }
 0x23c   : > { %v916_v40 = vsub.f32 %v2441_v0, %v688_v29  ;;  %v1279_v48 = vsub.f32 %v2441_v0, %v2759_v37  ;;  %v834_v9 = vrot.slane %v688_v29, 7  ;;  %v952_v8 = vrot.slane %v688_v29, 1 }
 0x23d   : > { %v1203_v60 = vrot.slane %v2759_v37, 7  ;;  %v1315_v56 = vrot.slane %v2759_v37, 1 }
 0x23e   : > { %v673_v38 = vpop.permute.xlu1 %672  ;;  %v675_v39 = vpop.permute.xlu0 %674  ;;  %v922_v52 = vmul.f32 %v916_v40, %v916_v40  ;;  %v1285_v61 = vmul.f32 %v1279_v48, %v1279_v48 }
 0x23f   : > { %v689_v41 = vsel %vm605_vm6, %v655_v11, %v673_v38  ;;  %v2766_v42 = vsel %vm606_vm7, %v673_v38, %v655_v11  ;;  %v2790_v10 = vsel %vm605_vm6, %v2738_v18, %v675_v39  ;;  %v2812_v13 = vsel %vm606_vm7, %v675_v39, %v2738_v18  ;;  %v2845_v38 = vpop.eup %1746 }
 0x240   : > { %v837_v49 = vrot.slane %v689_v41, 7  ;;  %v917_v53 = vsub.f32 %v2451_v2, %v689_v41  ;;  %v955_v54 = vrot.slane %v689_v41, 1  ;;  %v1206_v55 = vrot.slane %v2766_v42, 7 }
 0x241   : > { %v1318_v57 = vrot.slane %v2766_v42, 1  ;;  %v928_v16 = vsel %vm891_vm5, %v922_v52, 0.0  ;;  %v918_v20 = vsub.f32 %v2444_v1, %v2790_v10  ;;  %v1291_v23 = vsel %vm891_vm5, %v1285_v61, 0.0 }
 0x242   : > { %v677_v50 = vpop.permute.xlu1 %676  ;;  %v2776_v43 = vpop.permute.xlu0 %743  ;;  %v841_v62 = vsel %vm840_vm1, %v834_v9, %v837_v49  ;;  %v923_v17 = vmul.f32 %v917_v53, %v917_v53  ;;  %v959_v11 = vsel %vm958_vm3, %v952_v8, %v955_v54  ;;  %v1209_v32 = vsel %vm840_vm1, %v1203_v60, %v1206_v55 }
 0x243   : > { %v1321_v19 = vsel %vm958_vm3, %v1315_v56, %v1318_v57  ;;  %v2817_v21 = vsel %vm605_vm6, %v2750_v25, %v677_v50  ;;  %v2822_v14 = vsel %vm840_vm1, %v837_v49, %v834_v9  ;;  %v880_v15 = vsub.f32 %v2451_v2, %v841_v62  ;;  %v2857_v49 = vpop.eup %1748 }
 0x244   : > { %v1280_v24 = vsub.f32 %v2451_v2, %v2766_v42  ;;  %v2831_v18 = vsel %vm958_vm3, %v955_v54, %v952_v8  ;;  %v997_v27 = vsub.f32 %v2441_v0, %v959_v11  ;;  %v1244_v28 = vsub.f32 %v2451_v2, %v1209_v32 }
 0x245   : > { %v838_v29 = vrot.slane %v2817_v21, 7  ;;  %v1355_v31 = vsub.f32 %v2441_v0, %v1321_v19  ;;  %v835_v34 = vrot.slane %v2790_v10, 7  ;;  %v1281_v35 = vsub.f32 %v2444_v1, %v2812_v13 }
 0x246   : > { %v2795_v63 = vpop.permute.xlu1 %745  ;;  %v753_v22 = vpop.permute.xlu0 %752  ;;  %v2843_v37 = vsel %vm606_vm7, %v677_v50, %v2750_v25  ;;  %v933_v39 = vsel %vm891_vm5, %v923_v17, 0.0  ;;  %v2850_v40 = vsel %vm840_vm1, %v1206_v55, %v1203_v60  ;;  %v924_v41 = vmul.f32 %v918_v20, %v918_v20 }
 0x247   : > { %v919_v42 = vsub.f32 %v2454_v3, %v2817_v21  ;;  %v886_v45 = vmul.f32 %v880_v15, %v880_v15  ;;  %v1286_v48 = vmul.f32 %v1280_v24, %v1280_v24  ;;  %v842_v5 = vsel %vm840_vm1, %v835_v34, %v838_v29  ;;  %v2866_v60 = vpop.eup %1750 }
 0x248   : > { %v956_v25 = vrot.slane %v2817_v21, 1  ;;  %v1003_v50 = vmul.f32 %v997_v27, %v997_v27  ;;  %v1250_v4 = vmul.f32 %v1244_v28, %v1244_v28  ;;  %v2861_v51 = vsel %vm958_vm3, %v1318_v57, %v1315_v56 }
 0x249   : > { %v1207_v52 = vrot.slane %v2843_v37, 7  ;;  %v1361_v54 = vmul.f32 %v1355_v31, %v1355_v31  ;;  %v953_v55 = vrot.slane %v2790_v10, 1  ;;  %v1287_v9 = vmul.f32 %v1281_v35, %v1281_v35 }
 0x24a   : > { %v755_v30 = vpop.permute.xlu1 %754  ;;  %v661_v53 = vpop.permute.xlu0 %660  ;;  %v1319_v8 = vrot.slane %v2843_v37, 1  ;;  %v929_v61 = vsel %vm891_vm5, %v924_v41, 0.0  ;;  %v1204_v62 = vrot.slane %v2812_v13, 7  ;;  %v882_v17 = vsub.f32 %v2454_v3, %v842_v5 }
 0x24b   : > { %v925_v11 = vmul.f32 %v919_v42, %v919_v42  ;;  %v897_v56 = vsel %vm891_vm5, %v886_v45, 0.0  ;;  %v2875_v32 = vsel %vm891_vm5, %v1286_v48, 0.0  ;;  %v1316_v10 = vrot.slane %v2812_v13, 1 }
 0x24c   : > { %v960_v19 = vsel %vm958_vm3, %v953_v55, %v956_v25  ;;  %v2881_v20 = vsel %vm891_vm5, %v1003_v50, 0.0  ;;  %v2884_v21 = vsel %vm891_vm5, %v1250_v4, 0.0  ;;  %v1210_v15 = vsel %vm840_vm1, %v1204_v62, %v1207_v52 }
 0x24d   : > { %v761_v24 = vsel %vm605_vm6, %v2776_v43, %v753_v22  ;;  %v2892_v27 = vsel %vm891_vm5, %v1361_v54, 0.0  ;;  %v2894_v28 = vadd.f32 %v929_v61, %v928_v16  ;;  %v1292_v31 = vsel %vm891_vm5, %v1287_v9, 0.0 }
 0x24e   : > { %v2871_v57 = vpop.permute.xlu1 %662  ;;  %v1322_v35 = vsel %vm958_vm3, %v1316_v10, %v1319_v8  ;;  %v888_v41 = vmul.f32 %v882_v17, %v882_v17  ;;  %v934_v42 = vsel %vm891_vm5, %v925_v11, 0.0  ;;  %v999_v45 = vsub.f32 %v2444_v1, %v960_v19  ;;  %v679_v16 = vpop.permute.xlu0 %678 }
 0x24f   : > { %v1195_v48 = vsel %vm606_vm7, %v753_v22, %v2776_v43  ;;  %v1246_v5 = vsub.f32 %v2454_v3, %v1210_v15  ;;  %v1282_v50 = vsub.f32 %v2454_v3, %v2843_v37  ;;  %v854_v4 = vrot.slane %v761_v24, %v2637_v36 }
 0x250   : > { %v762_v54 = vsel %vm605_vm6, %v2795_v63, %v755_v30  ;;  %v1293_v9 = vadd.f32 %v1292_v31, %v1291_v23  ;;  %v845_v61 = vsel %vm840_vm1, %v838_v29, %v835_v34  ;;  %v2919_v17 = vsel %vm958_vm3, %v956_v25, %v953_v55 }
 0x251   : > { %v1357_v43 = vsub.f32 %v2444_v1, %v1322_v35  ;;  %v1218_v11 = vrot.slane %v1195_v48, %v2637_v36  ;;  %v858_v19 = vrot.slane %v762_v54, %v2637_v36  ;;  %v1196_v15 = vsel %vm606_vm7, %v755_v30, %v2795_v63 }
 0x252   : > { %v681_v22 = vpop.permute.xlu1 %680  ;;  %v2929_v23 = vsel %vm605_vm6, %v661_v53, %v679_v16  ;;  %v898_v29 = vsel %vm891_vm5, %v888_v41, 0.0  ;;  %v2932_v34 = vadd.f32 %v934_v42, %v933_v39  ;;  %v1005_v25 = vmul.f32 %v999_v45, %v999_v45 }
 0x253   : > { %v1213_v55 = vsel %vm840_vm1, %v1207_v52, %v1204_v62  ;;  %v1252_v24 = vmul.f32 %v1246_v5, %v1246_v5  ;;  %v1288_v31 = vmul.f32 %v1282_v50, %v1282_v50  ;;  %v863_v35 = vsel %vm601_vm2, %v854_v4, %v2822_v14  ;;  %v748_v50 = vpop.permute.xlu0 %747 }
 0x254   : > { %v920_v63 = vsub.f32 %v2469_v6, %v2929_v23  ;;  %v1363_v30 = vmul.f32 %v1357_v43, %v1357_v43  ;;  %v1222_v48 = vrot.slane %v1196_v15, %v2637_v36  ;;  %v2944_v39 = vsel %vm606_vm7, %v679_v16, %v661_v53 }
 0x255   : > { %v2949_v52 = vsel %vm605_vm6, %v2871_v57, %v681_v22  ;;  %v1227_v62 = vsel %vm601_vm2, %v1218_v11, %v2850_v40  ;;  %v865_v14 = vsel %vm601_vm2, %v858_v19, %v845_v61  ;;  %v1283_v42 = vsub.f32 %v2469_v6, %v2944_v39 }
 0x256   : > { %v926_v41 = vmul.f32 %v920_v63, %v920_v63  ;;  %v899_v45 = vadd.f32 %v898_v29, %v897_v56  ;;  %v1010_v53 = vsel %vm891_vm5, %v1005_v25, 0.0  ;;  %v836_v16 = vrot.slane %v2929_v23, 7  ;;  %v757_v4 = vpop.permute.xlu1 %756 }
 0x257   : > { %v839_v5 = vrot.slane %v2949_v52, 7  ;;  %v1297_v54 = vsel %vm891_vm5, %v1288_v31, 0.0  ;;  %v879_v40 = vsub.f32 %v2441_v0, %v863_v35  ;;  %v1289_v43 = vmul.f32 %v1283_v42, %v1283_v42 }
 0x258   : > { %v921_v61 = vsub.f32 %v2472_v7, %v2949_v52  ;;  %v1243_v11 = vsub.f32 %v2441_v0, %v1227_v62  ;;  %v881_v56 = vsub.f32 %v2444_v1, %v865_v14  ;;  %v1229_v19 = vsel %vm601_vm2, %v1222_v48, %v1213_v55 }
 0x259   : > { %v843_v15 = vsel %vm840_vm1, %v836_v16, %v839_v5  ;;  %v1261_v29 = vsel %vm891_vm5, %v1252_v24, 0.0  ;;  %v1368_v25 = vsel %vm891_vm5, %v1363_v30, 0.0  ;;  %v931_v31 = vsel %vm891_vm5, %v926_v41, 0.0 }
 0x25a   : > { %v884_v35 = vsub.f32 %v2472_v7, %v843_v15  ;;  %v954_v63 = vrot.slane %v2929_v23, 1  ;;  %v1294_v0 = vsel %vm891_vm5, %v1289_v43, 0.0  ;;  %v927_v62 = vmul.f32 %v921_v61, %v921_v61  ;;  %v786_v43 = vpop.permute.xlu0 %785  ;;  %v2987_v61 = vpop.permute.xlu1 %787 }
 0x25b   : > { %v957_v14 = vrot.slane %v2949_v52, 1  ;;  %v885_v42 = vmul.f32 %v879_v40, %v879_v40  ;;  %v1245_v55 = vsub.f32 %v2444_v1, %v1229_v19  ;;  %v2982_v24 = vsel %vm606_vm7, %v681_v22, %v2871_v57 }
 0x25c   : > { %v890_v48 = vmul.f32 %v884_v35, %v884_v35  ;;  %v1249_v30 = vmul.f32 %v1243_v11, %v1243_v11  ;;  %v887_v41 = vmul.f32 %v881_v56, %v881_v56  ;;  %v932_v15 = vadd.f32 %v931_v31, %v2894_v28 }
 0x25d   : > { %v961_v23 = vsel %vm958_vm3, %v954_v63, %v957_v14  ;;  %v1011_v52 = vadd.f32 %v1010_v53, %v2881_v20  ;;  %v2991_v1 = vadd.f32 %v1297_v54, %v2875_v32  ;;  %v2999_v57 = vsel %vm958_vm3, %v1319_v8, %v1316_v10 }
 0x25e   : > { %v1295_v28 = vadd.f32 %v1294_v0, %v1293_v9  ;;  %v3002_v22 = vadd.f32 %v1261_v29, %v2884_v21  ;;  %v3005_v40 = vadd.f32 %v1368_v25, %v2892_v27  ;;  %v936_v20 = vsel %vm891_vm5, %v927_v62, 0.0  ;;  %v795_v0 = vpop.permute.xlu0 %794  ;;  %v797_v62 = vpop.permute.xlu1 %796 }
 0x25f   : > { %v1208_v32 = vrot.slane %v2982_v24, 7  ;;  %v1251_v53 = vmul.f32 %v1245_v55, %v1245_v55  ;;  %v1205_v13 = vrot.slane %v2944_v39, 7  ;;  %v900_v37 = vsel %vm891_vm5, %v890_v48, 0.0 }
 0x260   : > { %v1001_v54 = vsub.f32 %v2469_v6, %v961_v23  ;;  %v892_v8 = vsel %vm891_vm5, %v885_v42, 0.0  ;;  %v1255_v10 = vsel %vm891_vm5, %v1249_v30, 0.0  ;;  %v893_v21 = vsel %vm891_vm5, %v887_v41, 0.0 }
 0x261   : > { %v940_v9 = vmul.f32 -1.0, %v932_v15  ;;  %v1303_v27 = vmul.f32 -1.0, %v1295_v28  ;;  %v937_v11 = vadd.f32 %v936_v20, %v2932_v34  ;;  %v1211_v56 = vsel %vm840_vm1, %v1205_v13, %v1208_v32 }
 0x262   : > { %v763_v19 = vsel %vm605_vm6, %v748_v50, %v757_v4  ;;  %v1317_v29 = vrot.slane %v2944_v39, 1  ;;  %v901_v25 = vadd.f32 %v900_v37, %v899_v45  ;;  %v1284_v31 = vsub.f32 %v2472_v7, %v2982_v24 }
 0x263   : > { %v1197_v35 = vsel %vm606_vm7, %v757_v4, %v748_v50  ;;  %v3025_v42 = vadd.f32 %v893_v21, %v892_v8  ;;  %v1256_v34 = vsel %vm891_vm5, %v1251_v53, 0.0  ;;  %v1007_v55 = vmul.f32 %v1001_v54, %v1001_v54 }
 0x264   : > { %v1320_v48 = vrot.slane %v2982_v24, 1  ;;  %v942_v30 = vmul.f32 1.442695, %v940_v9  ;;  %v846_v39 = vsel %vm840_vm1, %v839_v5, %v836_v16  ;;  %v1248_v45 = vsub.f32 %v2472_v7, %v1211_v56  ;;  %v790_v56 = vpop.permute.xlu0 %789 }
 0x265   : > { %v862_v41 = vrot.slane %v763_v19, %v2637_v36  ;;  %v1305_v15 = vmul.f32 1.442695, %v1303_v27  ;;  %v941_v23 = vmul.f32 -1.0, %v937_v11  ;;  %v1226_v50 = vrot.slane %v1197_v35, %v2637_v36 }
 0x266   : > { %v803_v4 = vsel %vm605_vm6, %v786_v43, %v795_v0  ;;  %v905_v28 = vmul.f32 -1.0, %v901_v25  ;;  %v1214_v20 = vsel %vm840_vm1, %v1208_v32, %v1205_v13  ;;  %v1290_v24 = vmul.f32 %v1284_v31, %v1284_v31  ;;  %v799_v13 = vpop.permute.xlu1 %798 }
 0x267   : > { %v867_v53 = vsel %vm601_vm2, %v862_v41, %v846_v39  ;;  %v1012_v16 = vsel %vm891_vm5, %v1007_v55, 0.0  ;;  %v1323_v7 = vsel %vm958_vm3, %v1317_v29, %v1320_v48  ;;  %v1231_v5 = vsel %vm601_vm2, %v1226_v50, %v1214_v20 }
 0x268   : > { %v972_v37 = vrot.slane %v803_v4, %v2637_v36  ;;  %v1257_v54 = vadd.f32 %v1256_v34, %v1255_v10  ;;  %v964_v8 = vsel %vm958_vm3, %v957_v14, %v954_v63  ;;  %v1254_v21 = vmul.f32 %v1248_v45, %v1248_v45 }
 0x269   : > { %v883_v32 = vsub.f32 %v2469_v6, %v867_v53  ;;  %1752 = vpow2.f32 %v942_v30  ;;  %v944_v9 = vmul.f32 1.442695, %v941_v23  ;;  %v1247_v27 = vsub.f32 %v2469_v6, %v1231_v5 }
 0x26a   : > { %v1198_v11 = vsel %vm606_vm7, %v795_v0, %v786_v43  ;;  %1754 = vpow2.f32 %v1305_v15  ;;  %v1013_v19 = vadd.f32 %v1012_v16, %v1011_v52  ;;  %v1299_v25 = vsel %vm891_vm5, %v1290_v24, 0.0 }
 0x26b   : > { %v1359_v10 = vsub.f32 %v2469_v6, %v1323_v7  ;;  %v3054_v31 = vmul.f32 1.442695, %v905_v28  ;;  %v982_v63 = vsel %vm604_vm4, %v972_v37, %v2831_v18  ;;  %v1330_v14 = vrot.slane %v1198_v11, %v2637_v36  ;;  %v1776_v7 = vld [vmem:[%s2409_s23 + $0x18] sm:$0xff]  ;;  %v1777_v11 = vld [vmem:[%s2409_s23 + $0x28] sm:$0xff]  ;;  %s1394_s23 = scalar_lea.sflag [#allocation4], %s2405_s16 }
 0x26c   : > { %v804_v35 = vsel %vm605_vm6, %v2987_v61, %v797_v62  ;;  %v1263_v43 = vsel %vm891_vm5, %v1254_v21, 0.0  ;;  %v1326_v52 = vsel %vm958_vm3, %v1320_v48, %v1317_v29  ;;  %v889_v0 = vmul.f32 %v883_v32, %v883_v32  ;;  %v3075_v29 = vpop.permute.xlu1 %710 }
 0x26d   : > { %v1253_v34 = vmul.f32 %v1247_v27, %v1247_v27  ;;  %1756 = vpow2.f32 %v944_v9  ;;  %v1300_v6 = vadd.f32 %v1299_v25, %v2991_v1  ;;  %v976_v55 = vrot.slane %v804_v35, %v2637_v36 }
 0x26e   : > { %v1199_v18 = vsel %vm606_vm7, %v797_v62, %v2987_v61  ;;  %v1021_v30 = vmul.f32 -1.0, %v1013_v19  ;;  %v1365_v39 = vmul.f32 %v1359_v10, %v1359_v10  ;;  %v998_v45 = vsub.f32 %v2451_v2, %v982_v63  ;;  %v3084_v62 = vpop.permute.xlu0 %708 }
 0x26f   : > { %v1340_v41 = vsel %vm604_vm4, %v1330_v14, %v2861_v51  ;;  %v1264_v48 = vadd.f32 %v1263_v43, %v3002_v22  ;;  %v984_v1 = vsel %vm604_vm4, %v976_v55, %v2919_v17  ;;  %v1334_v15 = vrot.slane %v1199_v18, %v2637_v36 }
 0x270   : > { %v805_v61 = vsel %vm605_vm6, %v790_v56, %v799_v13  ;;  %v895_v23 = vsel %vm891_vm5, %v889_v0, 0.0  ;;  %v1258_v51 = vsel %vm891_vm5, %v1253_v34, 0.0  ;;  %v1000_v50 = vsub.f32 %v2454_v3, %v984_v1  ;;  %v717_v19 = vpop.permute.xlu1 %716 }
 0x271   : > { %v980_v22 = vrot.slane %v805_v61, %v2637_v36  ;;  %v1304_v4 = vmul.f32 -1.0, %v1300_v6  ;;  %v1356_v28 = vsub.f32 %v2451_v2, %v1340_v41  ;;  %v1342_v17 = vsel %vm604_vm4, %v1334_v15, %v2999_v57 }
 0x272   : > { %v1200_v20 = vsel %vm606_vm7, %v799_v13, %v790_v56  ;;  %v1370_v24 = vsel %vm891_vm5, %v1365_v39, 0.0  ;;  %v1004_v53 = vmul.f32 %v998_v45, %v998_v45  ;;  %v1006_v16 = vmul.f32 %v1000_v50, %v1000_v50 }
 0x273   : > { %v1358_v5 = vsub.f32 %v1776_v7, %v1342_v17  ;;  %v3098_v3 = vpop.eup %1752  ;;  %v896_v37 = vadd.f32 %v895_v23, %v3025_v42  ;;  %v1259_v21 = vadd.f32 %v1258_v51, %v1257_v54  ;;  %v986_v2 = vsel %vm604_vm4, %v980_v22, %v964_v8  ;;  %v715_v54 = vpop.permute.xlu0 %714  ;;  %v3134_v7 = vld [vmem:[%s2417_s24] sm:$0xff] }
 0x274   : > { %v1338_v57 = vrot.slane %v1200_v20, %v2637_v36  ;;  %v3104_v32 = vpop.eup %1754  ;;  %v1023_v9 = vmul.f32 1.442695, %v1021_v30  ;;  %v1015_v13 = vsel %vm891_vm5, %v1006_v16, 0.0  ;;  %v1002_v56 = vsub.f32 %v1777_v11, %v986_v2  ;;  %v817_v51 = vpop.permute.xlu1 %816 }
 0x275   : > { %v1364_v27 = vmul.f32 %v1358_v5, %v1358_v5  ;;  %v1268_v25 = vmul.f32 -1.0, %v1264_v48  ;;  %v1307_v10 = vmul.f32 1.442695, %v1304_v4  ;;  %v1362_v63 = vmul.f32 %v1356_v28, %v1356_v28 }
 0x276   : > { %v1344_v42 = vsel %vm604_vm4, %v1338_v57, %v1326_v52  ;;  %v1371_v8 = vadd.f32 %v1370_v24, %v3005_v40  ;;  %v1014_v14 = vsel %vm891_vm5, %v1004_v53, 0.0  ;;  %v1008_v35 = vmul.f32 %v1002_v56, %v1002_v56 }
 0x277   : > { %v1360_v43 = vsub.f32 %v1777_v11, %v1344_v42  ;;  %v3112_v0 = vpop.eup %1756  ;;  %v904_v34 = vmul.f32 -1.0, %v896_v37  ;;  %v1267_v6 = vmul.f32 -1.0, %v1259_v21  ;;  %v1016_v55 = vadd.f32 %v1015_v13, %v1014_v14  ;;  %v814_v50 = vpop.permute.xlu0 %813  ;;  %v3138_v37 = vld [vmem:[%s2417_s24 + $0x8] sm:$0xff]  ;;  %s1966_s24 = scalar_lea.vmem %s1965_s11, 256 }
 0x278   : > { %v1373_v18 = vsel %vm891_vm5, %v1364_v27, 0.0  ;;  %v1017_v30 = vsel %vm891_vm5, %v1008_v35, 0.0  ;;  %v720_v52 = vsel %vm605_vm6, %v3084_v62, %v715_v54  ;;  %v721_v40 = vsel %vm605_vm6, %v3075_v29, %v717_v19  ;;  %v831_v11 = vpop.permute.xlu1 %830  ;;  %p1968_p8 = scmp.lt.s32.totalorder %s1966_s24, %s1960_s14 }
 0x279   : > { %v1366_v39 = vmul.f32 %v1360_v43, %v1360_v43  ;;  %v1372_v45 = vsel %vm891_vm5, %v1362_v63, 0.0  ;;  %v1018_v41 = vadd.f32 %v1017_v30, %v1016_v55  ;;  %v869_v48 = vrot.slane %v720_v52, 7 }
 0x27a   : > { %v870_v1 = vrot.slane %v721_v40, 7  ;;  %1758 = vpow2.f32 %v3054_v31  ;;  %v1271_v15 = vmul.f32 1.442695, %v1268_v25  ;;  %v1374_v61 = vadd.f32 %v1373_v18, %v1372_v45  ;;  %p1969_p4 = por %p1968_p8, %p1967_p12 }
 0x27b   : > { %v1375_v23 = vsel %vm891_vm5, %v1366_v39, 0.0  ;;  %1760 = vpow2.f32 %v1023_v9  ;;  %v1022_v22 = vmul.f32 -1.0, %v1018_v41  ;;  %v1104_v28 = vmul.f32 %v2798_v12, %v2798_v12 }
 0x27c   : > { %v871_v4 = vsel %vm840_vm1, %v869_v48, %v870_v1  ;;  %v3131_v17 = vmul.f32 %v2827_v26, %v2768_v46  ;;  %1762 = vpow2.f32 %v1307_v10  ;;  %v906_v31 = vmul.f32 1.442695, %v904_v34  ;;  %p1970_p11 = pnand %p1969_p4, %p1963_p9 }
 0x27d   : > { %v1376_v20 = vadd.f32 %v1375_v23, %v1374_v61  ;;  %v1379_v24 = vmul.f32 -1.0, %v1371_v8  ;;  %v1269_v53 = vmul.f32 1.442695, %v1267_v6  ;;  %v1025_v16 = vmul.f32 1.442695, %v1022_v22 }
 0x27e   : > { %v938_v5 = vsub.f32 %v3134_v7, %v720_v52  ;;  %1764 = vpow2.f32 %v1271_v15  ;;  %v903_v21 = vsub.f32 %v3138_v37, %v871_v4  ;;  %v988_v12 = vrot.slane %v721_v40, 1 }
 0x27f   : > { %v3143_v46 = vmul.f32 %v2784_v58, %v2784_v58  ;;  %1766 = vpow2.f32 %v1025_v16  ;;  %v939_v26 = vsub.f32 %v3138_v37, %v721_v40  ;;  %v1194_v2 = vsel %vm606_vm7, %v717_v19, %v3075_v29  ;;  %v828_v58 = vpop.permute.xlu0 %827 }
 0x280   : > { %v3150_v57 = vmul.f32 %v2866_v60, %v1104_v28  ;;  %1768 = vpow2.f32 %v906_v31  ;;  %v1380_v9 = vmul.f32 -1.0, %v1376_v20  ;;  %v987_v13 = vrot.slane %v720_v52, 1 }
 0x281   : > { %v1193_v27 = vsel %vm606_vm7, %v715_v54, %v3084_v62  ;;  %v1381_v56 = vmul.f32 1.442695, %v1379_v24  ;;  %1770 = vpow2.f32 %v1269_v53  ;;  %v946_v25 = vmul.f32 %v938_v5, %v938_v5 }
 0x282   : > { %v1233_v10 = vrot.slane %v1193_v27, 7  ;;  %v872_v63 = vsel %vm840_vm1, %v870_v1, %v869_v48  ;;  %v911_v29 = vmul.f32 %v903_v21, %v903_v21  ;;  %v989_v60 = vsel %vm958_vm3, %v987_v13, %v988_v12 }
 0x283   : > { %v1234_v19 = vrot.slane %v1194_v2, 7  ;;  %v947_v42 = vmul.f32 %v939_v26, %v939_v26  ;;  %v819_v8 = vsel %vm605_vm6, %v814_v50, %v817_v51  ;;  %v1201_v62 = vsel %vm606_vm7, %v817_v51, %v814_v50 }
 0x284   : > { %v833_v54 = vsel %vm605_vm6, %v828_v58, %v831_v11  ;;  %v1759_v14 = vpop.eup %1758  ;;  %v1383_v35 = vmul.f32 1.442695, %v1380_v9  ;;  %v876_v43 = vrot.slane %v819_v8, %v2637_v36  ;;  %v1240_v34 = vrot.slane %v1201_v62, %v2637_v36 }
 0x285   : > { %v994_v6 = vrot.slane %v833_v54, %v2637_v36  ;;  %v1761_v55 = vpop.eup %1760  ;;  %v990_v18 = vsel %vm958_vm3, %v988_v12, %v987_v13  ;;  %v1019_v30 = vsub.f32 %v3134_v7, %v989_v60  ;;  %v1346_v39 = vrot.slane %v1194_v2, 1 }
 0x286   : > { %v1202_v52 = vsel %vm606_vm7, %v831_v11, %v828_v58  ;;  %v1763_v40 = vpop.eup %1762  ;;  %v913_v45 = vmul.f32 %v1759_v14, %v911_v29  ;;  %v1235_v41 = vsel %vm840_vm1, %v1233_v10, %v1234_v19  ;;  %v877_v48 = vsel %vm601_vm2, %v876_v43, %v872_v63 }
 0x287   : > { %v996_v1 = vsel %vm604_vm4, %v994_v6, %v990_v18  ;;  %v1345_v15 = vrot.slane %v1193_v27, 1  ;;  %v1236_v61 = vsel %vm840_vm1, %v1234_v19, %v1233_v10  ;;  %v902_v23 = vsub.f32 %v3134_v7, %v877_v48 }
 0x288   : > { %v1020_v59 = vsub.f32 %v3138_v37, %v996_v1  ;;  %v1765_v51 = vpop.eup %1764  ;;  %1772 = vpow2.f32 %v1383_v35  ;;  %v949_v50 = vmul.f32 %v3112_v0, %v947_v42  ;;  %v1241_v22 = vsel %vm601_vm2, %v1240_v34, %v1236_v61 }
 0x289   : > { %v1352_v4 = vrot.slane %v1202_v52, %v2637_v36  ;;  %v1767_v28 = vpop.eup %1766  ;;  %v1027_v31 = vmul.f32 %v1019_v30, %v1019_v30  ;;  %v1266_v20 = vsub.f32 %v3138_v37, %v1235_v41  ;;  %v910_v24 = vmul.f32 %v902_v23, %v902_v23 }
 0x28a   : > { %v1028_v53 = vmul.f32 %v1020_v59, %v1020_v59  ;;  %v1769_v16 = vpop.eup %1768  ;;  %v948_v5 = vmul.f32 %v3098_v3, %v946_v25  ;;  %v951_v21 = vadd.f32 %v949_v50, %v913_v45  ;;  %v1302_v12 = vsub.f32 %v3138_v37, %v1194_v2 }
 0x28b   : > { %v1347_v0 = vsel %vm958_vm3, %v1345_v15, %v1346_v39  ;;  %v1771_v26 = vpop.eup %1770  ;;  %v1348_v9 = vsel %vm958_vm3, %v1346_v39, %v1345_v15  ;;  %v912_v36 = vmul.f32 %v1769_v16, %v910_v24  ;;  %v1265_v13 = vsub.f32 %v3134_v7, %v1241_v22 }
 0x28c   : > { %v1030_v11 = vmul.f32 %v1767_v28, %v1028_v53  ;;  %v1182_v58 = vmul.f32 %v2845_v38, %v2770_v47  ;;  %1774 = vpow2.f32 %v1381_v56  ;;  %v1301_v3 = vsub.f32 %v3134_v7, %v1193_v27 }
 0x28d   : > { %v1354_v2 = vsel %vm604_vm4, %v1352_v4, %v1348_v9  ;;  %v1029_v25 = vmul.f32 %v1761_v55, %v1027_v31  ;;  %v1274_v10 = vmul.f32 %v1266_v20, %v1266_v20  ;;  %v950_v63 = vadd.f32 %v948_v5, %v912_v36 }
 0x28e   : > { %v1032_v29 = vadd.f32 %v1030_v11, %v951_v21  ;;  %v1310_v60 = vmul.f32 %v1302_v12, %v1302_v12  ;;  %v1377_v33 = vsub.f32 %v3134_v7, %v1347_v0  ;;  %v1181_v19 = vmul.f32 %v2857_v49, %v3143_v46 }
 0x28f   : > { %v1031_v42 = vadd.f32 %v1029_v25, %v950_v63  ;;  %v1273_v8 = vmul.f32 %v1265_v13, %v1265_v13  ;;  %v1378_v38 = vsub.f32 %v3138_v37, %v1354_v2  ;;  %v1309_v27 = vmul.f32 %v1301_v3, %v1301_v3 }
 0x290   : > { %v1108_v47 = vadd.f32 %v3150_v57, %v1032_v29  ;;  %v1276_v56 = vmul.f32 %v1765_v51, %v1274_v10  ;;  %v1312_v14 = vmul.f32 %v1763_v40, %v1310_v60  ;;  %v1385_v35 = vmul.f32 %v1377_v33, %v1377_v33 }
 0x291   : > { %v1107_v44 = vadd.f32 %v3131_v17, %v1031_v42  ;;  %v1275_v43 = vmul.f32 %v1771_v26, %v1273_v8  ;;  %v1386_v49 = vmul.f32 %v1378_v38, %v1378_v38  ;;  %v1311_v46 = vmul.f32 %v3104_v32, %v1309_v27 }
 0x292   : > { %v1184_v62 = vadd.f32 %v1182_v58, %v1108_v47  ;;  %v1773_v54 = vpop.eup %1772 }
 0x293   : > { %v1183_v7 = vadd.f32 %v1181_v19, %v1107_v44  ;;  %v1388_v37 = vmul.f32 %v1773_v54, %v1386_v49 }
 0x294   : > { %v1278_v34 = vadd.f32 %v1276_v56, %v1184_v62 }
 0x295   : > { %v1277_v57 = vadd.f32 %v1275_v43, %v1183_v7 }
 0x296   : > { %v1314_v6 = vadd.f32 %v1312_v14, %v1278_v34  ;;  %v1775_v55 = vpop.eup %1774 }
 0x297   : > { %v1387_v18 = vmul.f32 %v1775_v55, %v1385_v35  ;;  %v1313_v17 = vadd.f32 %v1311_v46, %v1277_v57 }
 0x298   : > { %v1390_v30 = vadd.f32 %v1388_v37, %v1314_v6 }
 0x299   : > { %v1389_v39 = vadd.f32 %v1387_v18, %v1313_v17 }
 0x29b   : > { %v1391_v52 = vadd.f32 %v1390_v30, %v1389_v39 }
 0x29d   : > { %1392 = vst.msk [vmem:[%s541_s13] sm:$0xff] %vm891_vm5, %v1391_v52 }
 0x29e   : > { %1973 = shalt.err (!%p1970_p11)
}
 0x29f   : > { %s1974_s16 = scalar_lea.hbm %s3212_s1, 128  ;;  %s1978_s19 = scalar_lea.hbm %s3322_s20, 256 }
 0x2a0   : > { %p1975_p0 = scmp.ne.s32.totalorder %s3212_s1, %s1974_s16  ;;  %p1979_p5 = scmp.lt.u32.totalorder %s3212_s1, %s3322_s20 }
 0x2a1   : > { %p1980_p7 = scmp.lt.u32.totalorder %s1978_s19, %s1974_s16  ;;  %p1982_p13 = scmp.lt.u32.totalorder %s1974_s16, %s3212_s1 }
 0x2a2   : > { %p1976_p10 = pnand %p1975_p0, %p3323_p1 }
 0x2a3   : > { %p1981_p2 = por %p1980_p7, %p1979_p5 }
 0x2a4   : > { %p1977_p3 = pneg %p1976_p10 }
 0x2a5   : > { %p1983_p6 = por %p1982_p13, %p1981_p2 }
 0x2a7   : > { %p1984_p9 = pnand %p1983_p6, %p1977_p3 }
 0x2a9   : > { %1987 = shalt.err (!%p1984_p9)
}
 0x2aa   : > { %1662 = dma.vmem_to_hbm [thread:$0]  (%p3323_p1), %s3214_s10, 128, %s3212_s1, %s1394_s23  }
 0x2ab PF: > { %s3324_s26 = sld [smem:[#allocation19_spill]]  ;;  %s3325_s6 = sld [smem:[#allocation27_spill]] }
 0x2ac   : > { %s3326_s3 = sld [smem:[#allocation23_spill]] }
 0x2b1   : > { %s1420_s17 = sand.u32 1, %s3324_s26   ;;  %p3327_p12 = scmp.ne.s32.totalorder %s3325_s6, 0 }
 0x2b2   : > { %p3328_p8 = scmp.ge.s32.totalorder %s3326_s3, 2  ;;  %s1421_s9 = scalar_lea.sflag [#allocation4], %s1420_s17 }
 0x2b4   : > { %p1684_p4 = pnand %p3328_p8, %p3327_p12 }
 0x2b6   : > { %2029 = dma.done.wait (!%p1684_p4), %s1421_s9, 128  }
 0x2b7   : > { %2031 = vsyncadd (!%p1684_p4), %s1421_s9, 4294967168  ;;  %s31_s26 = sadd.s32 1, %s3326_s3   ;;  %s3329_s8 = sld [smem:[#allocation20_spill]] }
 0x2b8   : > { %p28_p11 = scmp.ge.s32.totalorder %s31_s26, 4   ;;  %s3330_s23 = sld [smem:[#allocation26_spill]] }
 0x2b9   : > { %s3331_s24 = sld [smem:[#allocation22_spill]]  ;;  %s3332_s25 = sld [smem:[#allocation24_spill]] }
 0x2ba   : > { %s3333_s21 = smov %s2038_s22  ;;  %30 = sbr.rel (!%p28_p11) target bundleno = 16 (0x10), region = 150 }
 0x2bd   : > { %s3334_s22 = smov %s3329_s8 }
 0x2c1   :  { %1426 = vsyncpa [#allocation3], 1 }
 0x2c2   :  { %1428 = vsyncpa [#allocation3 + $0x1], 1 }
 0x2c3   :  { %1429 = vsyncpa [#allocation6], 1 }
 0x2c4   :  { %1431 = vsyncpa [#allocation6 + $0x1], 1 }
 0x2c5   :  { %1432 = vsyncpa [#allocation9], 1 }
 0x2c6   :  { %1434 = vsyncpa [#allocation9 + $0x1], 1 }
 0x2c7   :  { %1435 = vsyncpa [#allocation12], 1 }
 0x2c8   :  { %1437 = vsyncpa [#allocation12 + $0x1], 1 }
 0x2c9   :  { %1438 = vsyncpa [#allocation4], 1 }
 0x2ca   :  { %1440 = vsyncpa [#allocation4 + $0x1], 1 }

</bundles_post_ra>
